<compile_context>
chip_gen: v7x
topology: tpu7x:2x2x1
jax: 0.10.0
libtpu: 0.0.40
codegen_flags: <defaults>
</compile_context>

<pallas_src>
import jax
import jax.numpy as jnp
from jax import lax
from jax.experimental import pallas as pl
from jax.experimental.pallas import tpu as pltpu


def lstm_fc_kernel(x_ref,            # (T*B, I)   time-major input, bf16
                   wih0_ref,         # (I, 4H)    layer-0 input->gates, bf16
                   whh0_ref,         # (H, 4H)    layer-0 hidden->gates, bf16
                   b0_ref,           # (1, 4H)    layer-0 bias (b_ih + b_hh), f32
                   wih1_ref,         # (H, 4H)    layer-1 input->gates, bf16
                   whh1_ref,         # (H, 4H)    layer-1 hidden->gates, bf16
                   b1_ref,           # (1, 4H)    layer-1 bias, f32
                   wfc_ref,          # (H, OP)    fc weight (transposed, lane-padded), f32
                   bfc_ref,          # (1, OP)    fc bias (lane-padded), f32
                   out_ref,          # (B, OP)    lane-dense output block
                   xp_ref):          # (T*B, 4H)  scratch: hoisted input projection
    TB = x_ref.shape[0]
    H = whh0_ref.shape[0]
    B = out_ref.shape[0]
    T = TB // B

    # ---- Hoisted layer-0 input projection for ALL timesteps (one lane-dense
    # matmul, bias folded in). Removes one matmul per step from the recurrence.
    xp_ref[...] = (jnp.dot(x_ref[...], wih0_ref[...],
                           preferred_element_type=jnp.float32)
                   + b0_ref[...])

    # ---- Loop-invariant weights / bias: load & broadcast once, outside loop.
    whh0 = whh0_ref[...]
    wih1 = wih1_ref[...]
    whh1 = whh1_ref[...]
    b1 = jnp.broadcast_to(b1_ref[...], (B, 4 * H))

    def gates_to_hc(z, c):
        # Packed gate order (i, f, o, g): one sigmoid over a contiguous (B, 3H)
        # lane slice and one tanh over the trailing (B, H) slice.
        a = jax.nn.sigmoid(z[:, :3 * H])
        g = jnp.tanh(z[:, 3 * H:])
        i = a[:, :H]
        f = a[:, H:2 * H]
        o = a[:, 2 * H:]
        c_new = f * c + i * g
        h_new = o * jnp.tanh(c_new)
        return h_new, c_new

    def step(t, carry):
        h0, c0, h1, c1 = carry
        start = pl.multiple_of(t * B, B)
        x_gates = xp_ref[pl.ds(start, B), :]                       # (B, 4H) f32
        # Layer 0: only the recurrent matmul remains on the critical path.
        z0 = x_gates + jnp.dot(h0.astype(jnp.bfloat16), whh0,
                               preferred_element_type=jnp.float32)
        h0, c0 = gates_to_hc(z0, c0)
        # Layer 1: fused-gate input + recurrent matmuls.
        z1 = (jnp.dot(h0.astype(jnp.bfloat16), wih1,
                      preferred_element_type=jnp.float32)
              + jnp.dot(h1.astype(jnp.bfloat16), whh1,
                        preferred_element_type=jnp.float32)
              + b1)
        h1, c1 = gates_to_hc(z1, c1)
        return (h0, c0, h1, c1)

    z = jnp.zeros((B, H), jnp.float32)
    # T is small & static -> fully unroll so the scheduler can overlap steps.
    _, _, h1, _ = lax.fori_loop(0, T, step, (z, z, z, z), unroll=True)

    # fc on the last time step's top-layer hidden state (lane-dense store).
    out_ref[...] = (jnp.dot(h1, wfc_ref[...],
                            preferred_element_type=jnp.float32)
                    + bfc_ref[...])


def trajectory_lstm_forward(x, params):
    """x: (batch, seq, input_size) float32. Returns (batch, output_size) float32."""
    B, T, I = x.shape
    H = params["whh0"].shape[0]
    O = params["wfc"].shape[-1]
    OP = 128 * pl.cdiv(O, 128)                 # lane-dense padded output width

    bf16 = jnp.bfloat16
    # Time-major, flattened so the hoisted input projection is one matmul.
    x2d = jnp.transpose(x, (1, 0, 2)).reshape(T * B, I).astype(bf16)
    wih0 = params["wih0"].astype(bf16)
    whh0 = params["whh0"].astype(bf16)
    wih1 = params["wih1"].astype(bf16)
    whh1 = params["whh1"].astype(bf16)
    wfc_p = jnp.zeros((H, OP), jnp.float32).at[:, :O].set(params["wfc"])
    bfc_p = jnp.zeros((1, OP), jnp.float32).at[:, :O].set(params["bfc"])

    # NOTE: at these toy shapes everything fits VMEM as full-array blocks. If
    # batch/hidden ever scale, add a batch grid with BlockSpec tiles,
    # dimension_semantics=("parallel",) (v7x: 2 TCs) and an explicit
    # vmem_limit_bytes (v7x: 64 MiB physical VMEM).
    vmem = pl.BlockSpec(memory_space=pltpu.MemorySpace.VMEM)
    out_p = pl.pallas_call(
        lstm_fc_kernel,
        out_shape=jax.ShapeDtypeStruct((B, OP), jnp.float32),
        in_specs=[vmem] * 9,
        out_specs=vmem,
        scratch_shapes=[pltpu.VMEM((T * B, 4 * H), jnp.float32)],
    )(x2d, wih0, whh0, params["b0"], wih1, whh1, params["b1"], wfc_p, bfc_p)
    return out_p[:, :O]


def init_params(key, input_size, hidden_size, output_size):
    """Deterministic synthetic params, PyTorch-style U(-1/sqrt(H), 1/sqrt(H)).

    Weights are packed for the fused-gate kernel: (in_dim, 4H) with gate order
    (i, f, o, g); biases pre-summed (b_ih + b_hh) as (1, 4H). fc is (H, O).
    """
    H, I, O = hidden_size, input_size, output_size
    k = 1.0 / jnp.sqrt(jnp.float32(H))
    keys = jax.random.split(key, 10)

    def u(kk, shape):
        return jax.random.uniform(kk, shape, jnp.float32, -k, k)

    # PyTorch native shapes, gate order (i, f, g, o).
    w_ih_l0 = u(keys[0], (4 * H, I))
    w_hh_l0 = u(keys[1], (4 * H, H))
    b_ih_l0 = u(keys[2], (4 * H,))
    b_hh_l0 = u(keys[3], (4 * H,))
    w_ih_l1 = u(keys[4], (4 * H, H))
    w_hh_l1 = u(keys[5], (4 * H, H))
    b_ih_l1 = u(keys[6], (4 * H,))
    b_hh_l1 = u(keys[7], (4 * H,))
    w_fc = u(keys[8], (O, H))
    b_fc = u(keys[9], (O,))

    order = jnp.array([0, 1, 3, 2])             # (i, f, g, o) -> (i, f, o, g)

    def pack_w(w, in_dim):
        w4 = w.reshape(4, H, in_dim)[order]     # (4, H, in_dim), reordered
        return jnp.transpose(w4, (2, 0, 1)).reshape(in_dim, 4 * H)

    def pack_b(b_ih, b_hh):
        return (b_ih + b_hh).reshape(4, H)[order].reshape(1, 4 * H)

    return {
        "wih0": pack_w(w_ih_l0, I),             # (I, 4H)
        "whh0": pack_w(w_hh_l0, H),             # (H, 4H)
        "b0":   pack_b(b_ih_l0, b_hh_l0),       # (1, 4H)
        "wih1": pack_w(w_ih_l1, H),             # (H, 4H)
        "whh1": pack_w(w_hh_l1, H),             # (H, 4H)
        "b1":   pack_b(b_ih_l1, b_hh_l1),       # (1, 4H)
        "wfc":  w_fc.T,                         # (H, O)
        "bfc":  b_fc.reshape(1, O),             # (1, O)
    }


def reference_forward(x, params, matmul_dtype=jnp.float32):
    """Pure-JAX reference of PyTorch nn.LSTM(batch_first, 2 layers) + Linear.

    matmul_dtype=bf16 mirrors the kernel's mixed precision exactly
    (bf16 operands, f32 accumulation, f32 element-wise/state math).
    """
    B, T, I = x.shape
    H = params["whh0"].shape[0]

    def mm(a, w):
        return jnp.dot(a.astype(matmul_dtype), w.astype(matmul_dtype),
                       preferred_element_type=jnp.float32)

    def gates_to_hc(z, c):
        a = jax.nn.sigmoid(z[:, :3 * H])
        g = jnp.tanh(z[:, 3 * H:])
        i, f, o = a[:, :H], a[:, H:2 * H], a[:, 2 * H:]
        c = f * c + i * g
        return o * jnp.tanh(c), c

    h0 = c0 = h1 = c1 = jnp.zeros((B, H), jnp.float32)
    for t in range(T):
        xt = x[:, t, :]
        z0 = mm(xt, params["wih0"]) + params["b0"] + mm(h0, params["whh0"])
        h0, c0 = gates_to_hc(z0, c0)
        z1 = mm(h0, params["wih1"]) + mm(h1, params["whh1"]) + params["b1"]
        h1, c1 = gates_to_hc(z1, c1)
    return jnp.dot(h1, params["wfc"],
                   preferred_element_type=jnp.float32) + params["bfc"]


if __name__ == "__main__":
    # Small, self-consistent shapes: batch=2, seq=8, input_size=8,
    # hidden_size=32 (so 4H = 128 lanes), num_layers=2, output_size=4.
    batch, seq, input_size, hidden_size, output_size = 2, 8, 8, 32, 4

    key = jax.random.PRNGKey(0)
    kx, kp = jax.random.split(key)
    x = jax.random.normal(kx, (batch, seq, input_size), jnp.float32)
    params = init_params(kp, input_size, hidden_size, output_size)

    out = jax.block_until_ready(jax.jit(trajectory_lstm_forward)(x, params))
    assert out.shape == (batch, output_size)

    # Tight check against a reference that mirrors the kernel's mixed precision.
    ref_mixed = reference_forward(x, params, matmul_dtype=jnp.bfloat16)
    assert jnp.allclose(out, ref_mixed, atol=5e-3, rtol=5e-3), \
        "Pallas output mismatch vs mixed-precision reference"

    # Loose check against the full-f32 reference (bounds bf16 operand drift).
    ref_f32 = reference_forward(x, params, matmul_dtype=jnp.float32)
    assert jnp.allclose(out, ref_f32, atol=5e-2, rtol=5e-2), \
        "Pallas output mismatch vs f32 reference"

    print("KERNEL_OK")
</pallas_src>

<mosaic_0001>
module attributes {stable_mosaic.version = 11 : i64} {
  func.func @lstm_fc_kernel(%arg0: memref<16x8xbf16, #tpu.memory_space<vmem>>, %arg1: memref<8x128xbf16, #tpu.memory_space<vmem>>, %arg2: memref<32x128xbf16, #tpu.memory_space<vmem>>, %arg3: memref<1x128xf32, #tpu.memory_space<vmem>>, %arg4: memref<32x128xbf16, #tpu.memory_space<vmem>>, %arg5: memref<32x128xbf16, #tpu.memory_space<vmem>>, %arg6: memref<1x128xf32, #tpu.memory_space<vmem>>, %arg7: memref<32x128xf32, #tpu.memory_space<vmem>>, %arg8: memref<1x128xf32, #tpu.memory_space<vmem>>, %arg9: memref<2x128xf32, #tpu.memory_space<vmem>>, %arg10: memref<16x128xf32, #tpu.memory_space<vmem>>) attributes {dimension_semantics = [], scalar_prefetch = 0 : i64, scratch_operands = 1 : i64, tpu.core_type = #tpu.core_type<tc>} {
    %c0 = arith.constant 0 : index
    %c0_0 = arith.constant 0 : index
    %0 = vector.load %arg0[%c0, %c0_0] : memref<16x8xbf16, #tpu.memory_space<vmem>>, vector<16x8xbf16>
    %c0_1 = arith.constant 0 : index
    %c0_2 = arith.constant 0 : index
    %1 = vector.load %arg1[%c0_1, %c0_2] : memref<8x128xbf16, #tpu.memory_space<vmem>>, vector<8x128xbf16>
    %cst = arith.constant dense<0.000000e+00> : vector<16x128xf32>
    %2 = tpu.matmul %0, %1, %cst {dimension_numbers = #tpu.dot_dimension_numbers<[1], [0], [0], [1], [0, 0, 1, 1], [], []>} : vector<16x8xbf16>, vector<8x128xbf16>, vector<16x128xf32> -> vector<16x128xf32>
    %c0_3 = arith.constant 0 : index
    %c0_4 = arith.constant 0 : index
    %3 = vector.load %arg3[%c0_3, %c0_4] : memref<1x128xf32, #tpu.memory_space<vmem>>, vector<1x128xf32>
    %4 = vector.broadcast %3 : vector<1x128xf32> to vector<16x128xf32>
    %5 = arith.addf %2, %4 : vector<16x128xf32>
    %c0_5 = arith.constant 0 : index
    %c0_6 = arith.constant 0 : index
    %6 = vector.load %arg10[%c0_5, %c0_6] : memref<16x128xf32, #tpu.memory_space<vmem>>, vector<16x128xf32>
    tpu.vector_store %arg10[%c0_5, %c0_6], %5 {strides = array<i32>} : memref<16x128xf32, #tpu.memory_space<vmem>>, vector<16x128xf32>,
    %c0_7 = arith.constant 0 : index
    %c0_8 = arith.constant 0 : index
    %7 = vector.load %arg2[%c0_7, %c0_8] : memref<32x128xbf16, #tpu.memory_space<vmem>>, vector<32x128xbf16>
    %c0_9 = arith.constant 0 : index
    %c0_10 = arith.constant 0 : index
    %8 = vector.load %arg4[%c0_9, %c0_10] : memref<32x128xbf16, #tpu.memory_space<vmem>>, vector<32x128xbf16>
    %c0_11 = arith.constant 0 : index
    %c0_12 = arith.constant 0 : index
    %9 = vector.load %arg5[%c0_11, %c0_12] : memref<32x128xbf16, #tpu.memory_space<vmem>>, vector<32x128xbf16>
    %c0_13 = arith.constant 0 : index
    %c0_14 = arith.constant 0 : index
    %10 = vector.load %arg6[%c0_13, %c0_14] : memref<1x128xf32, #tpu.memory_space<vmem>>, vector<1x128xf32>
    %11 = vector.shape_cast %10 : vector<1x128xf32> to vector<1x128xf32>
    %12 = vector.broadcast %11 : vector<1x128xf32> to vector<2x128xf32>
    %cst_15 = arith.constant 0.000000e+00 : f32
    %13 = vector.broadcast %cst_15 : f32 to vector<2x32xf32>
    %c0_i32 = arith.constant 0 : i32
    %c2_i32 = arith.constant 2 : i32
    %14 = arith.muli %c0_i32, %c2_i32 : i32
    %15 = tpu.assume_multiple %14, 2 : i32
    %16 = arith.index_cast %15 : i32 to index
    %c0_16 = arith.constant 0 : index
    %17 = vector.load %arg10[%16, %c0_16] : memref<16x128xf32, #tpu.memory_space<vmem>>, vector<2x128xf32>
    %18 = arith.truncf %13 : vector<2x32xf32> to vector<2x32xbf16>
    %cst_17 = arith.constant dense<0.000000e+00> : vector<2x128xf32>
    %19 = tpu.matmul %18, %7, %cst_17 {dimension_numbers = #tpu.dot_dimension_numbers<[1], [0], [0], [1], [0, 0, 1, 1], [], []>} : vector<2x32xbf16>, vector<32x128xbf16>, vector<2x128xf32> -> vector<2x128xf32>
    %20 = arith.addf %17, %19 : vector<2x128xf32>
    %21 = vector.extract_strided_slice %20 {offsets = [0, 0], sizes = [2, 96], strides = [1, 1]} : vector<2x128xf32> to vector<2x96xf32>
    %22 = arith.negf %21 : vector<2x96xf32>
    %23 = math.exp %22 : vector<2x96xf32>
    %cst_18 = arith.constant 1.000000e+00 : f32
    %24 = vector.broadcast %cst_18 : f32 to vector<2x96xf32>
    %25 = arith.addf %24, %23 : vector<2x96xf32>
    %26 = arith.divf %24, %25 : vector<2x96xf32>
    %27 = vector.extract_strided_slice %20 {offsets = [0, 96], sizes = [2, 32], strides = [1, 1]} : vector<2x128xf32> to vector<2x32xf32>
    %28 = math.tanh %27 : vector<2x32xf32>
    %29 = vector.extract_strided_slice %26 {offsets = [0, 0], sizes = [2, 32], strides = [1, 1]} : vector<2x96xf32> to vector<2x32xf32>
    %30 = vector.extract_strided_slice %26 {offsets = [0, 32], sizes = [2, 32], strides = [1, 1]} : vector<2x96xf32> to vector<2x32xf32>
    %31 = vector.extract_strided_slice %26 {offsets = [0, 64], sizes = [2, 32], strides = [1, 1]} : vector<2x96xf32> to vector<2x32xf32>
    %32 = arith.mulf %30, %13 : vector<2x32xf32>
    %33 = arith.mulf %29, %28 : vector<2x32xf32>
    %34 = arith.addf %32, %33 : vector<2x32xf32>
    %35 = math.tanh %34 : vector<2x32xf32>
    %36 = arith.mulf %31, %35 : vector<2x32xf32>
    %37 = arith.truncf %36 : vector<2x32xf32> to vector<2x32xbf16>
    %cst_19 = arith.constant dense<0.000000e+00> : vector<2x128xf32>
    %38 = tpu.matmul %37, %8, %cst_19 {dimension_numbers = #tpu.dot_dimension_numbers<[1], [0], [0], [1], [0, 0, 1, 1], [], []>} : vector<2x32xbf16>, vector<32x128xbf16>, vector<2x128xf32> -> vector<2x128xf32>
    %39 = arith.truncf %13 : vector<2x32xf32> to vector<2x32xbf16>
    %cst_20 = arith.constant dense<0.000000e+00> : vector<2x128xf32>
    %40 = tpu.matmul %39, %9, %cst_20 {dimension_numbers = #tpu.dot_dimension_numbers<[1], [0], [0], [1], [0, 0, 1, 1], [], []>} : vector<2x32xbf16>, vector<32x128xbf16>, vector<2x128xf32> -> vector<2x128xf32>
    %41 = arith.addf %38, %40 : vector<2x128xf32>
    %42 = arith.addf %41, %12 : vector<2x128xf32>
    %43 = vector.extract_strided_slice %42 {offsets = [0, 0], sizes = [2, 96], strides = [1, 1]} : vector<2x128xf32> to vector<2x96xf32>
    %44 = arith.negf %43 : vector<2x96xf32>
    %45 = math.exp %44 : vector<2x96xf32>
    %cst_21 = arith.constant 1.000000e+00 : f32
    %46 = vector.broadcast %cst_21 : f32 to vector<2x96xf32>
    %47 = arith.addf %46, %45 : vector<2x96xf32>
    %48 = arith.divf %46, %47 : vector<2x96xf32>
    %49 = vector.extract_strided_slice %42 {offsets = [0, 96], sizes = [2, 32], strides = [1, 1]} : vector<2x128xf32> to vector<2x32xf32>
    %50 = math.tanh %49 : vector<2x32xf32>
    %51 = vector.extract_strided_slice %48 {offsets = [0, 0], sizes = [2, 32], strides = [1, 1]} : vector<2x96xf32> to vector<2x32xf32>
    %52 = vector.extract_strided_slice %48 {offsets = [0, 32], sizes = [2, 32], strides = [1, 1]} : vector<2x96xf32> to vector<2x32xf32>
    %53 = vector.extract_strided_slice %48 {offsets = [0, 64], sizes = [2, 32], strides = [1, 1]} : vector<2x96xf32> to vector<2x32xf32>
    %54 = arith.mulf %52, %13 : vector<2x32xf32>
    %55 = arith.mulf %51, %50 : vector<2x32xf32>
    %56 = arith.addf %54, %55 : vector<2x32xf32>
    %57 = math.tanh %56 : vector<2x32xf32>
    %58 = arith.mulf %53, %57 : vector<2x32xf32>
    %c1_i32 = arith.constant 1 : i32
    %c2_i32_22 = arith.constant 2 : i32
    %59 = arith.muli %c1_i32, %c2_i32_22 : i32
    %60 = tpu.assume_multiple %59, 2 : i32
    %61 = arith.index_cast %60 : i32 to index
    %c0_23 = arith.constant 0 : index
    %62 = vector.load %arg10[%61, %c0_23] : memref<16x128xf32, #tpu.memory_space<vmem>>, vector<2x128xf32>
    %63 = arith.truncf %36 : vector<2x32xf32> to vector<2x32xbf16>
    %cst_24 = arith.constant dense<0.000000e+00> : vector<2x128xf32>
    %64 = tpu.matmul %63, %7, %cst_24 {dimension_numbers = #tpu.dot_dimension_numbers<[1], [0], [0], [1], [0, 0, 1, 1], [], []>} : vector<2x32xbf16>, vector<32x128xbf16>, vector<2x128xf32> -> vector<2x128xf32>
    %65 = arith.addf %62, %64 : vector<2x128xf32>
    %66 = vector.extract_strided_slice %65 {offsets = [0, 0], sizes = [2, 96], strides = [1, 1]} : vector<2x128xf32> to vector<2x96xf32>
    %67 = arith.negf %66 : vector<2x96xf32>
    %68 = math.exp %67 : vector<2x96xf32>
    %cst_25 = arith.constant 1.000000e+00 : f32
    %69 = vector.broadcast %cst_25 : f32 to vector<2x96xf32>
    %70 = arith.addf %69, %68 : vector<2x96xf32>
    %71 = arith.divf %69, %70 : vector<2x96xf32>
    %72 = vector.extract_strided_slice %65 {offsets = [0, 96], sizes = [2, 32], strides = [1, 1]} : vector<2x128xf32> to vector<2x32xf32>
    %73 = math.tanh %72 : vector<2x32xf32>
    %74 = vector.extract_strided_slice %71 {offsets = [0, 0], sizes = [2, 32], strides = [1, 1]} : vector<2x96xf32> to vector<2x32xf32>
    %75 = vector.extract_strided_slice %71 {offsets = [0, 32], sizes = [2, 32], strides = [1, 1]} : vector<2x96xf32> to vector<2x32xf32>
    %76 = vector.extract_strided_slice %71 {offsets = [0, 64], sizes = [2, 32], strides = [1, 1]} : vector<2x96xf32> to vector<2x32xf32>
    %77 = arith.mulf %75, %34 : vector<2x32xf32>
    %78 = arith.mulf %74, %73 : vector<2x32xf32>
    %79 = arith.addf %77, %78 : vector<2x32xf32>
    %80 = math.tanh %79 : vector<2x32xf32>
    %81 = arith.mulf %76, %80 : vector<2x32xf32>
    %82 = arith.truncf %81 : vector<2x32xf32> to vector<2x32xbf16>
    %cst_26 = arith.constant dense<0.000000e+00> : vector<2x128xf32>
    %83 = tpu.matmul %82, %8, %cst_26 {dimension_numbers = #tpu.dot_dimension_numbers<[1], [0], [0], [1], [0, 0, 1, 1], [], []>} : vector<2x32xbf16>, vector<32x128xbf16>, vector<2x128xf32> -> vector<2x128xf32>
    %84 = arith.truncf %58 : vector<2x32xf32> to vector<2x32xbf16>
    %cst_27 = arith.constant dense<0.000000e+00> : vector<2x128xf32>
    %85 = tpu.matmul %84, %9, %cst_27 {dimension_numbers = #tpu.dot_dimension_numbers<[1], [0], [0], [1], [0, 0, 1, 1], [], []>} : vector<2x32xbf16>, vector<32x128xbf16>, vector<2x128xf32> -> vector<2x128xf32>
    %86 = arith.addf %83, %85 : vector<2x128xf32>
    %87 = arith.addf %86, %12 : vector<2x128xf32>
    %88 = vector.extract_strided_slice %87 {offsets = [0, 0], sizes = [2, 96], strides = [1, 1]} : vector<2x128xf32> to vector<2x96xf32>
    %89 = arith.negf %88 : vector<2x96xf32>
    %90 = math.exp %89 : vector<2x96xf32>
    %cst_28 = arith.constant 1.000000e+00 : f32
    %91 = vector.broadcast %cst_28 : f32 to vector<2x96xf32>
    %92 = arith.addf %91, %90 : vector<2x96xf32>
    %93 = arith.divf %91, %92 : vector<2x96xf32>
    %94 = vector.extract_strided_slice %87 {offsets = [0, 96], sizes = [2, 32], strides = [1, 1]} : vector<2x128xf32> to vector<2x32xf32>
    %95 = math.tanh %94 : vector<2x32xf32>
    %96 = vector.extract_strided_slice %93 {offsets = [0, 0], sizes = [2, 32], strides = [1, 1]} : vector<2x96xf32> to vector<2x32xf32>
    %97 = vector.extract_strided_slice %93 {offsets = [0, 32], sizes = [2, 32], strides = [1, 1]} : vector<2x96xf32> to vector<2x32xf32>
    %98 = vector.extract_strided_slice %93 {offsets = [0, 64], sizes = [2, 32], strides = [1, 1]} : vector<2x96xf32> to vector<2x32xf32>
    %99 = arith.mulf %97, %56 : vector<2x32xf32>
    %100 = arith.mulf %96, %95 : vector<2x32xf32>
    %101 = arith.addf %99, %100 : vector<2x32xf32>
    %102 = math.tanh %101 : vector<2x32xf32>
    %103 = arith.mulf %98, %102 : vector<2x32xf32>
    %c2_i32_29 = arith.constant 2 : i32
    %c2_i32_30 = arith.constant 2 : i32
    %104 = arith.muli %c2_i32_29, %c2_i32_30 : i32
    %105 = tpu.assume_multiple %104, 2 : i32
    %106 = arith.index_cast %105 : i32 to index
    %c0_31 = arith.constant 0 : index
    %107 = vector.load %arg10[%106, %c0_31] : memref<16x128xf32, #tpu.memory_space<vmem>>, vector<2x128xf32>
    %108 = arith.truncf %81 : vector<2x32xf32> to vector<2x32xbf16>
    %cst_32 = arith.constant dense<0.000000e+00> : vector<2x128xf32>
    %109 = tpu.matmul %108, %7, %cst_32 {dimension_numbers = #tpu.dot_dimension_numbers<[1], [0], [0], [1], [0, 0, 1, 1], [], []>} : vector<2x32xbf16>, vector<32x128xbf16>, vector<2x128xf32> -> vector<2x128xf32>
    %110 = arith.addf %107, %109 : vector<2x128xf32>
    %111 = vector.extract_strided_slice %110 {offsets = [0, 0], sizes = [2, 96], strides = [1, 1]} : vector<2x128xf32> to vector<2x96xf32>
    %112 = arith.negf %111 : vector<2x96xf32>
    %113 = math.exp %112 : vector<2x96xf32>
    %cst_33 = arith.constant 1.000000e+00 : f32
    %114 = vector.broadcast %cst_33 : f32 to vector<2x96xf32>
    %115 = arith.addf %114, %113 : vector<2x96xf32>
    %116 = arith.divf %114, %115 : vector<2x96xf32>
    %117 = vector.extract_strided_slice %110 {offsets = [0, 96], sizes = [2, 32], strides = [1, 1]} : vector<2x128xf32> to vector<2x32xf32>
    %118 = math.tanh %117 : vector<2x32xf32>
    %119 = vector.extract_strided_slice %116 {offsets = [0, 0], sizes = [2, 32], strides = [1, 1]} : vector<2x96xf32> to vector<2x32xf32>
    %120 = vector.extract_strided_slice %116 {offsets = [0, 32], sizes = [2, 32], strides = [1, 1]} : vector<2x96xf32> to vector<2x32xf32>
    %121 = vector.extract_strided_slice %116 {offsets = [0, 64], sizes = [2, 32], strides = [1, 1]} : vector<2x96xf32> to vector<2x32xf32>
    %122 = arith.mulf %120, %79 : vector<2x32xf32>
    %123 = arith.mulf %119, %118 : vector<2x32xf32>
    %124 = arith.addf %122, %123 : vector<2x32xf32>
    %125 = math.tanh %124 : vector<2x32xf32>
    %126 = arith.mulf %121, %125 : vector<2x32xf32>
    %127 = arith.truncf %126 : vector<2x32xf32> to vector<2x32xbf16>
    %cst_34 = arith.constant dense<0.000000e+00> : vector<2x128xf32>
    %128 = tpu.matmul %127, %8, %cst_34 {dimension_numbers = #tpu.dot_dimension_numbers<[1], [0], [0], [1], [0, 0, 1, 1], [], []>} : vector<2x32xbf16>, vector<32x128xbf16>, vector<2x128xf32> -> vector<2x128xf32>
    %129 = arith.truncf %103 : vector<2x32xf32> to vector<2x32xbf16>
    %cst_35 = arith.constant dense<0.000000e+00> : vector<2x128xf32>
    %130 = tpu.matmul %129, %9, %cst_35 {dimension_numbers = #tpu.dot_dimension_numbers<[1], [0], [0], [1], [0, 0, 1, 1], [], []>} : vector<2x32xbf16>, vector<32x128xbf16>, vector<2x128xf32> -> vector<2x128xf32>
    %131 = arith.addf %128, %130 : vector<2x128xf32>
    %132 = arith.addf %131, %12 : vector<2x128xf32>
    %133 = vector.extract_strided_slice %132 {offsets = [0, 0], sizes = [2, 96], strides = [1, 1]} : vector<2x128xf32> to vector<2x96xf32>
    %134 = arith.negf %133 : vector<2x96xf32>
    %135 = math.exp %134 : vector<2x96xf32>
    %cst_36 = arith.constant 1.000000e+00 : f32
    %136 = vector.broadcast %cst_36 : f32 to vector<2x96xf32>
    %137 = arith.addf %136, %135 : vector<2x96xf32>
    %138 = arith.divf %136, %137 : vector<2x96xf32>
    %139 = vector.extract_strided_slice %132 {offsets = [0, 96], sizes = [2, 32], strides = [1, 1]} : vector<2x128xf32> to vector<2x32xf32>
    %140 = math.tanh %139 : vector<2x32xf32>
    %141 = vector.extract_strided_slice %138 {offsets = [0, 0], sizes = [2, 32], strides = [1, 1]} : vector<2x96xf32> to vector<2x32xf32>
    %142 = vector.extract_strided_slice %138 {offsets = [0, 32], sizes = [2, 32], strides = [1, 1]} : vector<2x96xf32> to vector<2x32xf32>
    %143 = vector.extract_strided_slice %138 {offsets = [0, 64], sizes = [2, 32], strides = [1, 1]} : vector<2x96xf32> to vector<2x32xf32>
    %144 = arith.mulf %142, %101 : vector<2x32xf32>
    %145 = arith.mulf %141, %140 : vector<2x32xf32>
    %146 = arith.addf %144, %145 : vector<2x32xf32>
    %147 = math.tanh %146 : vector<2x32xf32>
    %148 = arith.mulf %143, %147 : vector<2x32xf32>
    %c3_i32 = arith.constant 3 : i32
    %c2_i32_37 = arith.constant 2 : i32
    %149 = arith.muli %c3_i32, %c2_i32_37 : i32
    %150 = tpu.assume_multiple %149, 2 : i32
    %151 = arith.index_cast %150 : i32 to index
    %c0_38 = arith.constant 0 : index
    %152 = vector.load %arg10[%151, %c0_38] : memref<16x128xf32, #tpu.memory_space<vmem>>, vector<2x128xf32>
    %153 = arith.truncf %126 : vector<2x32xf32> to vector<2x32xbf16>
    %cst_39 = arith.constant dense<0.000000e+00> : vector<2x128xf32>
    %154 = tpu.matmul %153, %7, %cst_39 {dimension_numbers = #tpu.dot_dimension_numbers<[1], [0], [0], [1], [0, 0, 1, 1], [], []>} : vector<2x32xbf16>, vector<32x128xbf16>, vector<2x128xf32> -> vector<2x128xf32>
    %155 = arith.addf %152, %154 : vector<2x128xf32>
    %156 = vector.extract_strided_slice %155 {offsets = [0, 0], sizes = [2, 96], strides = [1, 1]} : vector<2x128xf32> to vector<2x96xf32>
    %157 = arith.negf %156 : vector<2x96xf32>
    %158 = math.exp %157 : vector<2x96xf32>
    %cst_40 = arith.constant 1.000000e+00 : f32
    %159 = vector.broadcast %cst_40 : f32 to vector<2x96xf32>
    %160 = arith.addf %159, %158 : vector<2x96xf32>
    %161 = arith.divf %159, %160 : vector<2x96xf32>
    %162 = vector.extract_strided_slice %155 {offsets = [0, 96], sizes = [2, 32], strides = [1, 1]} : vector<2x128xf32> to vector<2x32xf32>
    %163 = math.tanh %162 : vector<2x32xf32>
    %164 = vector.extract_strided_slice %161 {offsets = [0, 0], sizes = [2, 32], strides = [1, 1]} : vector<2x96xf32> to vector<2x32xf32>
    %165 = vector.extract_strided_slice %161 {offsets = [0, 32], sizes = [2, 32], strides = [1, 1]} : vector<2x96xf32> to vector<2x32xf32>
    %166 = vector.extract_strided_slice %161 {offsets = [0, 64], sizes = [2, 32], strides = [1, 1]} : vector<2x96xf32> to vector<2x32xf32>
    %167 = arith.mulf %165, %124 : vector<2x32xf32>
    %168 = arith.mulf %164, %163 : vector<2x32xf32>
    %169 = arith.addf %167, %168 : vector<2x32xf32>
    %170 = math.tanh %169 : vector<2x32xf32>
    %171 = arith.mulf %166, %170 : vector<2x32xf32>
    %172 = arith.truncf %171 : vector<2x32xf32> to vector<2x32xbf16>
    %cst_41 = arith.constant dense<0.000000e+00> : vector<2x128xf32>
    %173 = tpu.matmul %172, %8, %cst_41 {dimension_numbers = #tpu.dot_dimension_numbers<[1], [0], [0], [1], [0, 0, 1, 1], [], []>} : vector<2x32xbf16>, vector<32x128xbf16>, vector<2x128xf32> -> vector<2x128xf32>
    %174 = arith.truncf %148 : vector<2x32xf32> to vector<2x32xbf16>
    %cst_42 = arith.constant dense<0.000000e+00> : vector<2x128xf32>
    %175 = tpu.matmul %174, %9, %cst_42 {dimension_numbers = #tpu.dot_dimension_numbers<[1], [0], [0], [1], [0, 0, 1, 1], [], []>} : vector<2x32xbf16>, vector<32x128xbf16>, vector<2x128xf32> -> vector<2x128xf32>
    %176 = arith.addf %173, %175 : vector<2x128xf32>
    %177 = arith.addf %176, %12 : vector<2x128xf32>
    %178 = vector.extract_strided_slice %177 {offsets = [0, 0], sizes = [2, 96], strides = [1, 1]} : vector<2x128xf32> to vector<2x96xf32>
    %179 = arith.negf %178 : vector<2x96xf32>
    %180 = math.exp %179 : vector<2x96xf32>
    %cst_43 = arith.constant 1.000000e+00 : f32
    %181 = vector.broadcast %cst_43 : f32 to vector<2x96xf32>
    %182 = arith.addf %181, %180 : vector<2x96xf32>
    %183 = arith.divf %181, %182 : vector<2x96xf32>
    %184 = vector.extract_strided_slice %177 {offsets = [0, 96], sizes = [2, 32], strides = [1, 1]} : vector<2x128xf32> to vector<2x32xf32>
    %185 = math.tanh %184 : vector<2x32xf32>
    %186 = vector.extract_strided_slice %183 {offsets = [0, 0], sizes = [2, 32], strides = [1, 1]} : vector<2x96xf32> to vector<2x32xf32>
    %187 = vector.extract_strided_slice %183 {offsets = [0, 32], sizes = [2, 32], strides = [1, 1]} : vector<2x96xf32> to vector<2x32xf32>
    %188 = vector.extract_strided_slice %183 {offsets = [0, 64], sizes = [2, 32], strides = [1, 1]} : vector<2x96xf32> to vector<2x32xf32>
    %189 = arith.mulf %187, %146 : vector<2x32xf32>
    %190 = arith.mulf %186, %185 : vector<2x32xf32>
    %191 = arith.addf %189, %190 : vector<2x32xf32>
    %192 = math.tanh %191 : vector<2x32xf32>
    %193 = arith.mulf %188, %192 : vector<2x32xf32>
    %c4_i32 = arith.constant 4 : i32
    %c2_i32_44 = arith.constant 2 : i32
    %194 = arith.muli %c4_i32, %c2_i32_44 : i32
    %195 = tpu.assume_multiple %194, 2 : i32
    %196 = arith.index_cast %195 : i32 to index
    %c0_45 = arith.constant 0 : index
    %197 = vector.load %arg10[%196, %c0_45] : memref<16x128xf32, #tpu.memory_space<vmem>>, vector<2x128xf32>
    %198 = arith.truncf %171 : vector<2x32xf32> to vector<2x32xbf16>
    %cst_46 = arith.constant dense<0.000000e+00> : vector<2x128xf32>
    %199 = tpu.matmul %198, %7, %cst_46 {dimension_numbers = #tpu.dot_dimension_numbers<[1], [0], [0], [1], [0, 0, 1, 1], [], []>} : vector<2x32xbf16>, vector<32x128xbf16>, vector<2x128xf32> -> vector<2x128xf32>
    %200 = arith.addf %197, %199 : vector<2x128xf32>
    %201 = vector.extract_strided_slice %200 {offsets = [0, 0], sizes = [2, 96], strides = [1, 1]} : vector<2x128xf32> to vector<2x96xf32>
    %202 = arith.negf %201 : vector<2x96xf32>
    %203 = math.exp %202 : vector<2x96xf32>
    %cst_47 = arith.constant 1.000000e+00 : f32
    %204 = vector.broadcast %cst_47 : f32 to vector<2x96xf32>
    %205 = arith.addf %204, %203 : vector<2x96xf32>
    %206 = arith.divf %204, %205 : vector<2x96xf32>
    %207 = vector.extract_strided_slice %200 {offsets = [0, 96], sizes = [2, 32], strides = [1, 1]} : vector<2x128xf32> to vector<2x32xf32>
    %208 = math.tanh %207 : vector<2x32xf32>
    %209 = vector.extract_strided_slice %206 {offsets = [0, 0], sizes = [2, 32], strides = [1, 1]} : vector<2x96xf32> to vector<2x32xf32>
    %210 = vector.extract_strided_slice %206 {offsets = [0, 32], sizes = [2, 32], strides = [1, 1]} : vector<2x96xf32> to vector<2x32xf32>
    %211 = vector.extract_strided_slice %206 {offsets = [0, 64], sizes = [2, 32], strides = [1, 1]} : vector<2x96xf32> to vector<2x32xf32>
    %212 = arith.mulf %210, %169 : vector<2x32xf32>
    %213 = arith.mulf %209, %208 : vector<2x32xf32>
    %214 = arith.addf %212, %213 : vector<2x32xf32>
    %215 = math.tanh %214 : vector<2x32xf32>
    %216 = arith.mulf %211, %215 : vector<2x32xf32>
    %217 = arith.truncf %216 : vector<2x32xf32> to vector<2x32xbf16>
    %cst_48 = arith.constant dense<0.000000e+00> : vector<2x128xf32>
    %218 = tpu.matmul %217, %8, %cst_48 {dimension_numbers = #tpu.dot_dimension_numbers<[1], [0], [0], [1], [0, 0, 1, 1], [], []>} : vector<2x32xbf16>, vector<32x128xbf16>, vector<2x128xf32> -> vector<2x128xf32>
    %219 = arith.truncf %193 : vector<2x32xf32> to vector<2x32xbf16>
    %cst_49 = arith.constant dense<0.000000e+00> : vector<2x128xf32>
    %220 = tpu.matmul %219, %9, %cst_49 {dimension_numbers = #tpu.dot_dimension_numbers<[1], [0], [0], [1], [0, 0, 1, 1], [], []>} : vector<2x32xbf16>, vector<32x128xbf16>, vector<2x128xf32> -> vector<2x128xf32>
    %221 = arith.addf %218, %220 : vector<2x128xf32>
    %222 = arith.addf %221, %12 : vector<2x128xf32>
    %223 = vector.extract_strided_slice %222 {offsets = [0, 0], sizes = [2, 96], strides = [1, 1]} : vector<2x128xf32> to vector<2x96xf32>
    %224 = arith.negf %223 : vector<2x96xf32>
    %225 = math.exp %224 : vector<2x96xf32>
    %cst_50 = arith.constant 1.000000e+00 : f32
    %226 = vector.broadcast %cst_50 : f32 to vector<2x96xf32>
    %227 = arith.addf %226, %225 : vector<2x96xf32>
    %228 = arith.divf %226, %227 : vector<2x96xf32>
    %229 = vector.extract_strided_slice %222 {offsets = [0, 96], sizes = [2, 32], strides = [1, 1]} : vector<2x128xf32> to vector<2x32xf32>
    %230 = math.tanh %229 : vector<2x32xf32>
    %231 = vector.extract_strided_slice %228 {offsets = [0, 0], sizes = [2, 32], strides = [1, 1]} : vector<2x96xf32> to vector<2x32xf32>
    %232 = vector.extract_strided_slice %228 {offsets = [0, 32], sizes = [2, 32], strides = [1, 1]} : vector<2x96xf32> to vector<2x32xf32>
    %233 = vector.extract_strided_slice %228 {offsets = [0, 64], sizes = [2, 32], strides = [1, 1]} : vector<2x96xf32> to vector<2x32xf32>
    %234 = arith.mulf %232, %191 : vector<2x32xf32>
    %235 = arith.mulf %231, %230 : vector<2x32xf32>
    %236 = arith.addf %234, %235 : vector<2x32xf32>
    %237 = math.tanh %236 : vector<2x32xf32>
    %238 = arith.mulf %233, %237 : vector<2x32xf32>
    %c5_i32 = arith.constant 5 : i32
    %c2_i32_51 = arith.constant 2 : i32
    %239 = arith.muli %c5_i32, %c2_i32_51 : i32
    %240 = tpu.assume_multiple %239, 2 : i32
    %241 = arith.index_cast %240 : i32 to index
    %c0_52 = arith.constant 0 : index
    %242 = vector.load %arg10[%241, %c0_52] : memref<16x128xf32, #tpu.memory_space<vmem>>, vector<2x128xf32>
    %243 = arith.truncf %216 : vector<2x32xf32> to vector<2x32xbf16>
    %cst_53 = arith.constant dense<0.000000e+00> : vector<2x128xf32>
    %244 = tpu.matmul %243, %7, %cst_53 {dimension_numbers = #tpu.dot_dimension_numbers<[1], [0], [0], [1], [0, 0, 1, 1], [], []>} : vector<2x32xbf16>, vector<32x128xbf16>, vector<2x128xf32> -> vector<2x128xf32>
    %245 = arith.addf %242, %244 : vector<2x128xf32>
    %246 = vector.extract_strided_slice %245 {offsets = [0, 0], sizes = [2, 96], strides = [1, 1]} : vector<2x128xf32> to vector<2x96xf32>
    %247 = arith.negf %246 : vector<2x96xf32>
    %248 = math.exp %247 : vector<2x96xf32>
    %cst_54 = arith.constant 1.000000e+00 : f32
    %249 = vector.broadcast %cst_54 : f32 to vector<2x96xf32>
    %250 = arith.addf %249, %248 : vector<2x96xf32>
    %251 = arith.divf %249, %250 : vector<2x96xf32>
    %252 = vector.extract_strided_slice %245 {offsets = [0, 96], sizes = [2, 32], strides = [1, 1]} : vector<2x128xf32> to vector<2x32xf32>
    %253 = math.tanh %252 : vector<2x32xf32>
    %254 = vector.extract_strided_slice %251 {offsets = [0, 0], sizes = [2, 32], strides = [1, 1]} : vector<2x96xf32> to vector<2x32xf32>
    %255 = vector.extract_strided_slice %251 {offsets = [0, 32], sizes = [2, 32], strides = [1, 1]} : vector<2x96xf32> to vector<2x32xf32>
    %256 = vector.extract_strided_slice %251 {offsets = [0, 64], sizes = [2, 32], strides = [1, 1]} : vector<2x96xf32> to vector<2x32xf32>
    %257 = arith.mulf %255, %214 : vector<2x32xf32>
    %258 = arith.mulf %254, %253 : vector<2x32xf32>
    %259 = arith.addf %257, %258 : vector<2x32xf32>
    %260 = math.tanh %259 : vector<2x32xf32>
    %261 = arith.mulf %256, %260 : vector<2x32xf32>
    %262 = arith.truncf %261 : vector<2x32xf32> to vector<2x32xbf16>
    %cst_55 = arith.constant dense<0.000000e+00> : vector<2x128xf32>
    %263 = tpu.matmul %262, %8, %cst_55 {dimension_numbers = #tpu.dot_dimension_numbers<[1], [0], [0], [1], [0, 0, 1, 1], [], []>} : vector<2x32xbf16>, vector<32x128xbf16>, vector<2x128xf32> -> vector<2x128xf32>
    %264 = arith.truncf %238 : vector<2x32xf32> to vector<2x32xbf16>
    %cst_56 = arith.constant dense<0.000000e+00> : vector<2x128xf32>
    %265 = tpu.matmul %264, %9, %cst_56 {dimension_numbers = #tpu.dot_dimension_numbers<[1], [0], [0], [1], [0, 0, 1, 1], [], []>} : vector<2x32xbf16>, vector<32x128xbf16>, vector<2x128xf32> -> vector<2x128xf32>
    %266 = arith.addf %263, %265 : vector<2x128xf32>
    %267 = arith.addf %266, %12 : vector<2x128xf32>
    %268 = vector.extract_strided_slice %267 {offsets = [0, 0], sizes = [2, 96], strides = [1, 1]} : vector<2x128xf32> to vector<2x96xf32>
    %269 = arith.negf %268 : vector<2x96xf32>
    %270 = math.exp %269 : vector<2x96xf32>
    %cst_57 = arith.constant 1.000000e+00 : f32
    %271 = vector.broadcast %cst_57 : f32 to vector<2x96xf32>
    %272 = arith.addf %271, %270 : vector<2x96xf32>
    %273 = arith.divf %271, %272 : vector<2x96xf32>
    %274 = vector.extract_strided_slice %267 {offsets = [0, 96], sizes = [2, 32], strides = [1, 1]} : vector<2x128xf32> to vector<2x32xf32>
    %275 = math.tanh %274 : vector<2x32xf32>
    %276 = vector.extract_strided_slice %273 {offsets = [0, 0], sizes = [2, 32], strides = [1, 1]} : vector<2x96xf32> to vector<2x32xf32>
    %277 = vector.extract_strided_slice %273 {offsets = [0, 32], sizes = [2, 32], strides = [1, 1]} : vector<2x96xf32> to vector<2x32xf32>
    %278 = vector.extract_strided_slice %273 {offsets = [0, 64], sizes = [2, 32], strides = [1, 1]} : vector<2x96xf32> to vector<2x32xf32>
    %279 = arith.mulf %277, %236 : vector<2x32xf32>
    %280 = arith.mulf %276, %275 : vector<2x32xf32>
    %281 = arith.addf %279, %280 : vector<2x32xf32>
    %282 = math.tanh %281 : vector<2x32xf32>
    %283 = arith.mulf %278, %282 : vector<2x32xf32>
    %c6_i32 = arith.constant 6 : i32
    %c2_i32_58 = arith.constant 2 : i32
    %284 = arith.muli %c6_i32, %c2_i32_58 : i32
    %285 = tpu.assume_multiple %284, 2 : i32
    %286 = arith.index_cast %285 : i32 to index
    %c0_59 = arith.constant 0 : index
    %287 = vector.load %arg10[%286, %c0_59] : memref<16x128xf32, #tpu.memory_space<vmem>>, vector<2x128xf32>
    %288 = arith.truncf %261 : vector<2x32xf32> to vector<2x32xbf16>
    %cst_60 = arith.constant dense<0.000000e+00> : vector<2x128xf32>
    %289 = tpu.matmul %288, %7, %cst_60 {dimension_numbers = #tpu.dot_dimension_numbers<[1], [0], [0], [1], [0, 0, 1, 1], [], []>} : vector<2x32xbf16>, vector<32x128xbf16>, vector<2x128xf32> -> vector<2x128xf32>
    %290 = arith.addf %287, %289 : vector<2x128xf32>
    %291 = vector.extract_strided_slice %290 {offsets = [0, 0], sizes = [2, 96], strides = [1, 1]} : vector<2x128xf32> to vector<2x96xf32>
    %292 = arith.negf %291 : vector<2x96xf32>
    %293 = math.exp %292 : vector<2x96xf32>
    %cst_61 = arith.constant 1.000000e+00 : f32
    %294 = vector.broadcast %cst_61 : f32 to vector<2x96xf32>
    %295 = arith.addf %294, %293 : vector<2x96xf32>
    %296 = arith.divf %294, %295 : vector<2x96xf32>
    %297 = vector.extract_strided_slice %290 {offsets = [0, 96], sizes = [2, 32], strides = [1, 1]} : vector<2x128xf32> to vector<2x32xf32>
    %298 = math.tanh %297 : vector<2x32xf32>
    %299 = vector.extract_strided_slice %296 {offsets = [0, 0], sizes = [2, 32], strides = [1, 1]} : vector<2x96xf32> to vector<2x32xf32>
    %300 = vector.extract_strided_slice %296 {offsets = [0, 32], sizes = [2, 32], strides = [1, 1]} : vector<2x96xf32> to vector<2x32xf32>
    %301 = vector.extract_strided_slice %296 {offsets = [0, 64], sizes = [2, 32], strides = [1, 1]} : vector<2x96xf32> to vector<2x32xf32>
    %302 = arith.mulf %300, %259 : vector<2x32xf32>
    %303 = arith.mulf %299, %298 : vector<2x32xf32>
    %304 = arith.addf %302, %303 : vector<2x32xf32>
    %305 = math.tanh %304 : vector<2x32xf32>
    %306 = arith.mulf %301, %305 : vector<2x32xf32>
    %307 = arith.truncf %306 : vector<2x32xf32> to vector<2x32xbf16>
    %cst_62 = arith.constant dense<0.000000e+00> : vector<2x128xf32>
    %308 = tpu.matmul %307, %8, %cst_62 {dimension_numbers = #tpu.dot_dimension_numbers<[1], [0], [0], [1], [0, 0, 1, 1], [], []>} : vector<2x32xbf16>, vector<32x128xbf16>, vector<2x128xf32> -> vector<2x128xf32>
    %309 = arith.truncf %283 : vector<2x32xf32> to vector<2x32xbf16>
    %cst_63 = arith.constant dense<0.000000e+00> : vector<2x128xf32>
    %310 = tpu.matmul %309, %9, %cst_63 {dimension_numbers = #tpu.dot_dimension_numbers<[1], [0], [0], [1], [0, 0, 1, 1], [], []>} : vector<2x32xbf16>, vector<32x128xbf16>, vector<2x128xf32> -> vector<2x128xf32>
    %311 = arith.addf %308, %310 : vector<2x128xf32>
    %312 = arith.addf %311, %12 : vector<2x128xf32>
    %313 = vector.extract_strided_slice %312 {offsets = [0, 0], sizes = [2, 96], strides = [1, 1]} : vector<2x128xf32> to vector<2x96xf32>
    %314 = arith.negf %313 : vector<2x96xf32>
    %315 = math.exp %314 : vector<2x96xf32>
    %cst_64 = arith.constant 1.000000e+00 : f32
    %316 = vector.broadcast %cst_64 : f32 to vector<2x96xf32>
    %317 = arith.addf %316, %315 : vector<2x96xf32>
    %318 = arith.divf %316, %317 : vector<2x96xf32>
    %319 = vector.extract_strided_slice %312 {offsets = [0, 96], sizes = [2, 32], strides = [1, 1]} : vector<2x128xf32> to vector<2x32xf32>
    %320 = math.tanh %319 : vector<2x32xf32>
    %321 = vector.extract_strided_slice %318 {offsets = [0, 0], sizes = [2, 32], strides = [1, 1]} : vector<2x96xf32> to vector<2x32xf32>
    %322 = vector.extract_strided_slice %318 {offsets = [0, 32], sizes = [2, 32], strides = [1, 1]} : vector<2x96xf32> to vector<2x32xf32>
    %323 = vector.extract_strided_slice %318 {offsets = [0, 64], sizes = [2, 32], strides = [1, 1]} : vector<2x96xf32> to vector<2x32xf32>
    %324 = arith.mulf %322, %281 : vector<2x32xf32>
    %325 = arith.mulf %321, %320 : vector<2x32xf32>
    %326 = arith.addf %324, %325 : vector<2x32xf32>
    %327 = math.tanh %326 : vector<2x32xf32>
    %328 = arith.mulf %323, %327 : vector<2x32xf32>
    %c7_i32 = arith.constant 7 : i32
    %c2_i32_65 = arith.constant 2 : i32
    %329 = arith.muli %c7_i32, %c2_i32_65 : i32
    %330 = tpu.assume_multiple %329, 2 : i32
    %331 = arith.index_cast %330 : i32 to index
    %c0_66 = arith.constant 0 : index
    %332 = vector.load %arg10[%331, %c0_66] : memref<16x128xf32, #tpu.memory_space<vmem>>, vector<2x128xf32>
    %333 = arith.truncf %306 : vector<2x32xf32> to vector<2x32xbf16>
    %cst_67 = arith.constant dense<0.000000e+00> : vector<2x128xf32>
    %334 = tpu.matmul %333, %7, %cst_67 {dimension_numbers = #tpu.dot_dimension_numbers<[1], [0], [0], [1], [0, 0, 1, 1], [], []>} : vector<2x32xbf16>, vector<32x128xbf16>, vector<2x128xf32> -> vector<2x128xf32>
    %335 = arith.addf %332, %334 : vector<2x128xf32>
    %336 = vector.extract_strided_slice %335 {offsets = [0, 0], sizes = [2, 96], strides = [1, 1]} : vector<2x128xf32> to vector<2x96xf32>
    %337 = arith.negf %336 : vector<2x96xf32>
    %338 = math.exp %337 : vector<2x96xf32>
    %cst_68 = arith.constant 1.000000e+00 : f32
    %339 = vector.broadcast %cst_68 : f32 to vector<2x96xf32>
    %340 = arith.addf %339, %338 : vector<2x96xf32>
    %341 = arith.divf %339, %340 : vector<2x96xf32>
    %342 = vector.extract_strided_slice %335 {offsets = [0, 96], sizes = [2, 32], strides = [1, 1]} : vector<2x128xf32> to vector<2x32xf32>
    %343 = math.tanh %342 : vector<2x32xf32>
    %344 = vector.extract_strided_slice %341 {offsets = [0, 0], sizes = [2, 32], strides = [1, 1]} : vector<2x96xf32> to vector<2x32xf32>
    %345 = vector.extract_strided_slice %341 {offsets = [0, 32], sizes = [2, 32], strides = [1, 1]} : vector<2x96xf32> to vector<2x32xf32>
    %346 = vector.extract_strided_slice %341 {offsets = [0, 64], sizes = [2, 32], strides = [1, 1]} : vector<2x96xf32> to vector<2x32xf32>
    %347 = arith.mulf %345, %304 : vector<2x32xf32>
    %348 = arith.mulf %344, %343 : vector<2x32xf32>
    %349 = arith.addf %347, %348 : vector<2x32xf32>
    %350 = math.tanh %349 : vector<2x32xf32>
    %351 = arith.mulf %346, %350 : vector<2x32xf32>
    %352 = arith.truncf %351 : vector<2x32xf32> to vector<2x32xbf16>
    %cst_69 = arith.constant dense<0.000000e+00> : vector<2x128xf32>
    %353 = tpu.matmul %352, %8, %cst_69 {dimension_numbers = #tpu.dot_dimension_numbers<[1], [0], [0], [1], [0, 0, 1, 1], [], []>} : vector<2x32xbf16>, vector<32x128xbf16>, vector<2x128xf32> -> vector<2x128xf32>
    %354 = arith.truncf %328 : vector<2x32xf32> to vector<2x32xbf16>
    %cst_70 = arith.constant dense<0.000000e+00> : vector<2x128xf32>
    %355 = tpu.matmul %354, %9, %cst_70 {dimension_numbers = #tpu.dot_dimension_numbers<[1], [0], [0], [1], [0, 0, 1, 1], [], []>} : vector<2x32xbf16>, vector<32x128xbf16>, vector<2x128xf32> -> vector<2x128xf32>
    %356 = arith.addf %353, %355 : vector<2x128xf32>
    %357 = arith.addf %356, %12 : vector<2x128xf32>
    %358 = vector.extract_strided_slice %357 {offsets = [0, 0], sizes = [2, 96], strides = [1, 1]} : vector<2x128xf32> to vector<2x96xf32>
    %359 = arith.negf %358 : vector<2x96xf32>
    %360 = math.exp %359 : vector<2x96xf32>
    %cst_71 = arith.constant 1.000000e+00 : f32
    %361 = vector.broadcast %cst_71 : f32 to vector<2x96xf32>
    %362 = arith.addf %361, %360 : vector<2x96xf32>
    %363 = arith.divf %361, %362 : vector<2x96xf32>
    %364 = vector.extract_strided_slice %357 {offsets = [0, 96], sizes = [2, 32], strides = [1, 1]} : vector<2x128xf32> to vector<2x32xf32>
    %365 = math.tanh %364 : vector<2x32xf32>
    %366 = vector.extract_strided_slice %363 {offsets = [0, 0], sizes = [2, 32], strides = [1, 1]} : vector<2x96xf32> to vector<2x32xf32>
    %367 = vector.extract_strided_slice %363 {offsets = [0, 32], sizes = [2, 32], strides = [1, 1]} : vector<2x96xf32> to vector<2x32xf32>
    %368 = vector.extract_strided_slice %363 {offsets = [0, 64], sizes = [2, 32], strides = [1, 1]} : vector<2x96xf32> to vector<2x32xf32>
    %369 = arith.mulf %367, %326 : vector<2x32xf32>
    %370 = arith.mulf %366, %365 : vector<2x32xf32>
    %371 = arith.addf %369, %370 : vector<2x32xf32>
    %372 = math.tanh %371 : vector<2x32xf32>
    %373 = arith.mulf %368, %372 : vector<2x32xf32>
    %c8_i32 = arith.constant 8 : i32
    %c0_72 = arith.constant 0 : index
    %c0_73 = arith.constant 0 : index
    %374 = vector.load %arg7[%c0_72, %c0_73] : memref<32x128xf32, #tpu.memory_space<vmem>>, vector<32x128xf32>
    %cst_74 = arith.constant dense<0.000000e+00> : vector<2x128xf32>
    %375 = tpu.matmul %373, %374, %cst_74 {dimension_numbers = #tpu.dot_dimension_numbers<[1], [0], [0], [1], [0, 0, 1, 1], [], []>} : vector<2x32xf32>, vector<32x128xf32>, vector<2x128xf32> -> vector<2x128xf32>
    %c0_75 = arith.constant 0 : index
    %c0_76 = arith.constant 0 : index
    %376 = vector.load %arg8[%c0_75, %c0_76] : memref<1x128xf32, #tpu.memory_space<vmem>>, vector<1x128xf32>
    %377 = vector.broadcast %376 : vector<1x128xf32> to vector<2x128xf32>
    %378 = arith.addf %375, %377 : vector<2x128xf32>
    %c0_77 = arith.constant 0 : index
    %c0_78 = arith.constant 0 : index
    %379 = vector.load %arg9[%c0_77, %c0_78] : memref<2x128xf32, #tpu.memory_space<vmem>>, vector<2x128xf32>
    tpu.vector_store %arg9[%c0_77, %c0_78], %378 {strides = array<i32>} : memref<2x128xf32, #tpu.memory_space<vmem>>, vector<2x128xf32>,
    return
  }
}

</mosaic_0001>

<bundles_post_ra>
// kernel: trajectory_lstm_forward.1
= control target key start
LH: loop header
LB: loop body
LE: loop exit
PB: predicated region body
PF: predicated region fallthrough
CT: control target
= control target key end

     0   :  { %vm53_vm0 = vcmask 1043456   ;;  %v2256_v1 = vmov 0.0   ;;  %vm2257_vm1 = vmmov 0   ;;  %vm49_vm2 = vcmask 64512   ;;  %s2692_s0 = inlined_call_operand.vmem [shape: bf16[16,8], index: 0, kind: input, shape index: {}]   ;;  %s2693_s1 = inlined_call_operand.vmem [shape: bf16[8,128], index: 1, kind: input, shape index: {}]   ;;  %s2694_s2 = inlined_call_operand.vmem [shape: bf16[32,128], index: 2, kind: input, shape index: {}]   ;;  %s2695_s3 = inlined_call_operand.vmem [shape: f32[1,128], index: 3, kind: input, shape index: {}]   ;;  %s2696_s4 = inlined_call_operand.vmem [shape: bf16[32,128], index: 4, kind: input, shape index: {}]   ;;  %s2697_s5 = inlined_call_operand.vmem [shape: bf16[32,128], index: 5, kind: input, shape index: {}]   ;;  %s2698_s6 = inlined_call_operand.vmem [shape: f32[1,128], index: 6, kind: input, shape index: {}]   ;;  %s2699_s7 = inlined_call_operand.vmem [shape: f32[32,128], index: 7, kind: input, shape index: {}]   ;;  %s2700_s8 = inlined_call_operand.vmem [shape: f32[1,128], index: 8, kind: input, shape index: {}]   ;;  %s2701_s9 = inlined_call_operand.hbm [shape: f32[2,128], index: 9, kind: output, shape index: {}]  }
   0x1   :  { %v36_v0 = vld [vmem:[%s2693_s1] sm:$0xf]  ;;  %1869 = vmatprep.subr.bf16.mxu0 %v2256_v1  ;;  %1871 = vmatprep.mubr.msk.bf16.mxu0 %vm2257_vm1, %v2256_v1  ;;  %v2335_v5 = vld [vmem:[%s2694_s2 + $0x8] sm:$0xff]  }
   0x2   :  { %v55_v2 = vsel %vm53_vm0, %v36_v0, 0  ;;  %v2091_v3 = vld [vmem:[%s2692_s0] sm:$0xff]   ;;  %1875 = vmatprep.subr.bf16.mxu1 %v2256_v1  ;;  %1879 = vmatprep.mubr.msk.bf16.mxu1 %vm2257_vm1, %v2256_v1 }
   0x3   :  { %1870 = vmatpush3.bf16.msra.mxu0 %v55_v2  ;;  %v2326_v4 = vld [vmem:[%s2694_s2] sm:$0xff]  }
   0x4   :  { %1883 = vmatprep.subr.bf16.mxu0 %v2256_v1  ;;  %1876 = vmatpush3.bf16.msra.mxu1 %v2326_v4 }
   0x5   :  { %1877 = vmatprep.subr.bf16.mxu1 %v2256_v1 }
   0x6   :  { %1872 = vmatmul.mubr.msk.bf16.vlgmr.msra.gmra.mrb[0].mxu0 %vm49_vm2, %v2091_v3 }
   0x7   :  { %1887 = vmatprep.mubr.msk.bf16.mxu0 %vm2257_vm1, %v2256_v1 }
   0x8   :  { %14 = vsyncpa [#allocation4], 0  ;;  %1878 = vmatpush3.bf16.msra.mxu1 %v2335_v5  ;;  %v2258_v6 = vmov 0   ;;  %v1740_v7 = vld [vmem:[%s2695_s3] ss:$0 sm:$0xff]  ;;  %s2259_s17 = smov 32  }
   0x9   :  { %1891 = vmatprep.subr.bf16.mxu1 %v2256_v1  ;;  %v2355_v30 = vld [vmem:[%s2697_s5] sm:$0xff]   ;;  %v2366_v32 = vld [vmem:[%s2697_s5 + $0x8] sm:$0xff]   ;;  %s2260_s25 = smov 64   ;;  %vm132_vm3 = vcmask 261120   ;;  %s2262_s23 = smov [#allocation3]  }
   0xa   :  { %v2360_v31 = vld [vmem:[%s2696_s4] sm:$0xff]   ;;  %1884 = vmatpush3.bf16.msra.mxu0 %v2355_v30  ;;  %v2372_v33 = vld [vmem:[%s2696_s4 + $0x8] sm:$0xff]  }
   0xb   :  { %1880 = vmatmul.mubr.bf16.vlgmr.msra.gmra.mrb[0].mxu1 %v2258_v6  ;;  %1885 = vmatprep.subr.bf16.mxu0 %v2256_v1  ;;  %v2405_v43 = vld [vmem:[%s2698_s6] ss:$0 sm:$0xff] }
   0xc   :  { %1895 = vmatprep.mubr.msk.bf16.mxu1 %vm2257_vm1, %v2256_v1  ;;  %1892 = vmatpush3.bf16.msra.mxu1 %v2360_v31 }
   0xd   :  { %1893 = vmatprep.subr.bf16.mxu1 %v2256_v1 }
   0xe   :  { %1886 = vmatpush3.bf16.msra.mxu0 %v2366_v32 }
   0xf   :  { %1899 = vmatprep.subr.bf16.mxu0 %v2256_v1 }
  0x10   :  { %1894 = vmatpush3.bf16.msra.mxu1 %v2372_v33 }
  0x11   :  { %1907 = vmatprep.subr.bf16.mxu1 %v2256_v1  ;;  %1888 = vmatmul.mubr.bf16.vlgmr.msra.gmra.mrb[4].mxu0 %v2258_v6 }
  0x12   :  { %1900 = vmatpush3.bf16.msra.mxu0 %v2326_v4  ;;  %1903 = vmatprep.mubr.msk.bf16.mxu0 %vm2257_vm1, %v2256_v1 }
  0x13   :  { %1901 = vmatprep.subr.bf16.mxu0 %v2256_v1 }
  0x16   :  { %1902 = vmatpush3.bf16.msra.mxu0 %v2335_v5 }
  0x17   :  { %1915 = vmatprep.subr.bf16.mxu0 %v2256_v1 }
  0xd9   :  { %v91_v8 = vpop.f32.mrb[0].mxu0 }
  0xda   :  { %v92_v9 = vadd.f32 %v1740_v7, %v91_v8  ;;  %v1873_v10 = vpop.f32.mrb[1].mxu0 }
  0xdb   :  { %v94_v11 = vpop.f32.mrb[2].mxu0 }
  0xdc   :  { %98 = vst [vmem:[#allocation2] sm:$0xff] %v92_v9  ;;  %v95_v12 = vadd.f32 %v1740_v7, %v94_v11  ;;  %v1874_v13 = vpop.f32.mrb[3].mxu0 }
  0xde   :  { %99 = vst [vmem:[#allocation2 + $0x8] sm:$0xff] %v95_v12  ;;  %v170_v14 = vpop.f32.mrb[0].mxu1 }
  0xdf   :  { %v1881_v15 = vpop.f32.mrb[1].mxu1 }
  0xe0   :  { %v173_v16 = vpop.f32.mrb[2].mxu1 }
  0xe1   :  { %v1882_v17 = vpop.f32.mrb[3].mxu1 }
  0xe3   :  { %v119_v18 = vld [vmem:[#allocation2] sm:$0x3]  ;;  %v338_v45 = vld [vmem:[#allocation2 + $0x2] sm:$0x3] }
  0xe4   :  { %v176_v19 = vadd.f32 %v170_v14, %v119_v18  ;;  %v248_v38 = vpop.f32.mrb[4].mxu0 }
  0xe5   :  { %v1889_v39 = vpop.f32.mrb[5].mxu0 }
  0xe6   :  { %2098 = vtanh.f32 %v176_v19  ;;  %v1746_v21 = vmul.f32 -1.442695, %v176_v19  ;;  %v251_v40 = vpop.f32.mrb[6].mxu0  ;;  %v524_v39 = vld [vmem:[#allocation2 + $0x4] sm:$0x3] }
  0xe7   :  { %v1890_v41 = vpop.f32.mrb[7].mxu0 }
  0xe8   :  { %2100 = vpow2.f32 %v1746_v21 }
  0xf0   :  { %v2099_v20 = vpop.eup %2098 }
  0xf1   :  { %186 = vrot.lane.b32.xlu0 %v2099_v20, %s2259_s17 }
  0xf2   :  { %v2101_v22 = vpop.eup %2100 }
  0xf3   :  { %v180_v23 = vadd.f32 1.0, %v2101_v22 }
  0xf5   :  { %2102 = vrcp.f32 %v180_v23 }
  0xff   :  { %v2103_v24 = vpop.eup %2102 }
 0x100   :  { %v184_v27 = vmul.f32 0.0, %v2103_v24 }
 0x163   :  { %v187_v25 = vpop.permute.xlu0 %186 }
 0x164   :  { %v189_v26 = vmul.f32 %v2103_v24, %v187_v25 }
 0x166   :  { %191 = vrot.lane.b32.xlu0 %v189_v26, %s2259_s17 }
 0x1d8   :  { %v192_v28 = vpop.permute.xlu0 %191 }
 0x1d9   :  { %v2349_v29 = vadd.f32 %v192_v28, %v184_v27 }
 0x1db   :  { %2104 = vtanh.f32 %v2349_v29 }
 0x1e5   :  { %v2105_v34 = vpop.eup %2104 }
 0x1e6   :  { %197 = vrot.lane.b32.xlu1 %v2105_v34, %s2259_s17 }
 0x258   :  { %v198_v35 = vpop.permute.xlu1 %197 }
 0x259   :  { %v200_v36 = vmul.f32 %v2103_v24, %v198_v35 }
 0x25b   :  { %v201_v37 = vpack.c.bf16 %v200_v36, %v200_v36 }
 0x25d   :  { %255 = vrot.lane.b32.xlu1 %v201_v37, %s2260_s25 }
 0x2cf   :  { %v256_v42 = vpop.permute.xlu1 %255 }
 0x2d0   :  { %1896 = vmatmul.mubr.msk.bf16.vlgmr.msra.gmra.mrb[4].mxu1 %vm132_vm3, %v256_v42  ;;  %1904 = vmatmul.mubr.msk.bf16.vlgmr.msra.gmra.mrb[8].mxu0 %vm132_vm3, %v256_v42 }
 0x2d1   :  { %1916 = vmatpush3.bf16.msra.mxu0 %v2360_v31  ;;  %1908 = vmatpush3.bf16.msra.mxu1 %v2355_v30 }
 0x2d2   :  { %1917 = vmatprep.subr.bf16.mxu0 %v2256_v1  ;;  %1909 = vmatprep.subr.bf16.mxu1 %v2256_v1 }
 0x2d3   :  { %1919 = vmatprep.mubr.msk.bf16.mxu0 %vm2257_vm1, %v2256_v1  ;;  %1911 = vmatprep.mubr.msk.bf16.mxu1 %vm2257_vm1, %v2256_v1 }
 0x2d5   :  { %1918 = vmatpush3.bf16.msra.mxu0 %v2372_v33  ;;  %1910 = vmatpush3.bf16.msra.mxu1 %v2366_v32 }
 0x2d6   :  { %1923 = vmatprep.subr.bf16.mxu1 %v2256_v1  ;;  %1931 = vmatprep.subr.bf16.mxu0 %v2256_v1 }
 0x3a3   :  { %v306_v44 = vpop.f32.mrb[4].mxu1  ;;  %v373_v46 = vpop.f32.mrb[8].mxu0 }
 0x3a4   :  { %v307_v47 = vadd.f32 %v306_v44, %v248_v38  ;;  %v379_v48 = vadd.f32 %v373_v46, %v338_v45  ;;  %v1897_v49 = vpop.f32.mrb[5].mxu1  ;;  %v1905_v50 = vpop.f32.mrb[9].mxu0 }
 0x3a5   :  { %v309_v51 = vpop.f32.mrb[6].mxu1  ;;  %v376_v52 = vpop.f32.mrb[10].mxu0 }
 0x3a6   :  { %v312_v53 = vadd.f32 %v2405_v43, %v307_v47  ;;  %2106 = vtanh.f32 %v379_v48  ;;  %v1898_v54 = vpop.f32.mrb[7].mxu1  ;;  %v1906_v55 = vpop.f32.mrb[11].mxu0  ;;  %v1754_v58 = vmul.f32 -1.442695, %v379_v48 }
 0x3a8   :  { %2108 = vtanh.f32 %v312_v53  ;;  %v1752_v59 = vmul.f32 -1.442695, %v312_v53 }
 0x3a9   :  { %2110 = vpow2.f32 %v1754_v58 }
 0x3aa   :  { %2112 = vpow2.f32 %v1752_v59 }
 0x3b0   :  { %v2107_v56 = vpop.eup %2106 }
 0x3b1   :  { %389 = vrot.lane.b32.xlu1 %v2107_v56, %s2259_s17 }
 0x3b2   :  { %v2109_v57 = vpop.eup %2108 }
 0x3b3   :  { %322 = vrot.lane.b32.xlu0 %v2109_v57, %s2259_s17  ;;  %v2111_v60 = vpop.eup %2110 }
 0x3b4   :  { %v2113_v61 = vpop.eup %2112  ;;  %v383_v62 = vadd.f32 1.0, %v2111_v60 }
 0x3b5   :  { %v316_v63 = vadd.f32 1.0, %v2113_v61 }
 0x3b6   :  { %2114 = vrcp.f32 %v383_v62 }
 0x3b7   :  { %2116 = vrcp.f32 %v316_v63 }
 0x3c0   :  { %v2115_v0 = vpop.eup %2114 }
 0x3c1   :  { %v2117_v6 = vpop.eup %2116  ;;  %v387_v9 = vmul.f32 %v2115_v0, %v2349_v29 }
 0x3c2   :  { %v320_v12 = vmul.f32 0.0, %v2117_v6 }
 0x423   :  { %v390_v2 = vpop.permute.xlu1 %389 }
 0x424   :  { %v392_v3 = vmul.f32 %v2115_v0, %v390_v2 }
 0x425   :  { %v323_v7 = vpop.permute.xlu0 %322 }
 0x426   :  { %v325_v8 = vmul.f32 %v2117_v6, %v323_v7  ;;  %394 = vrot.lane.b32.xlu1 %v392_v3, %s2259_s17 }
 0x428   :  { %327 = vrot.lane.b32.xlu0 %v325_v8, %s2259_s17 }
 0x498   :  { %v395_v10 = vpop.permute.xlu1 %394 }
 0x499   :  { %v2413_v11 = vadd.f32 %v395_v10, %v387_v9 }
 0x49a   :  { %v328_v13 = vpop.permute.xlu0 %327 }
 0x49b   :  { %2118 = vtanh.f32 %v2413_v11  ;;  %v2416_v14 = vadd.f32 %v328_v13, %v320_v12 }
 0x49d   :  { %2120 = vtanh.f32 %v2416_v14 }
 0x4a5   :  { %v2119_v15 = vpop.eup %2118 }
 0x4a6   :  { %400 = vrot.lane.b32.xlu1 %v2119_v15, %s2259_s17 }
 0x4a7   :  { %v2121_v16 = vpop.eup %2120 }
 0x4a8   :  { %333 = vrot.lane.b32.xlu0 %v2121_v16, %s2259_s17 }
 0x518   :  { %v401_v17 = vpop.permute.xlu1 %400 }
 0x519   :  { %v403_v18 = vmul.f32 %v2115_v0, %v401_v17 }
 0x51a   :  { %v334_v19 = vpop.permute.xlu0 %333 }
 0x51b   :  { %v404_v20 = vpack.c.bf16 %v403_v18, %v403_v18  ;;  %v336_v21 = vmul.f32 %v2117_v6, %v334_v19 }
 0x51d   :  { %v405_v22 = vpack.c.bf16 %v336_v21, %v336_v21  ;;  %453 = vrot.lane.b32.xlu1 %v404_v20, %s2260_s25 }
 0x51f   :  { %407 = vrot.lane.b32.xlu0 %v405_v22, %s2260_s25 }
 0x58f   :  { %v454_v23 = vpop.permute.xlu1 %453 }
 0x590   :  { %1920 = vmatmul.mubr.msk.bf16.vlgmr.msra.gmra.mrb[12].mxu0 %vm132_vm3, %v454_v23 }
 0x591   :  { %v408_v24 = vpop.permute.xlu0 %407  ;;  %1932 = vmatpush3.bf16.msra.mxu0 %v2355_v30  ;;  %1935 = vmatprep.mubr.msk.bf16.mxu0 %vm2257_vm1, %v2256_v1 }
 0x592   :  { %1912 = vmatmul.mubr.msk.bf16.vlgmr.msra.gmra.mrb[8].mxu1 %vm132_vm3, %v408_v24  ;;  %1933 = vmatprep.subr.bf16.mxu0 %v2256_v1 }
 0x593   :  { %1924 = vmatpush3.bf16.msra.mxu1 %v2326_v4  ;;  %1927 = vmatprep.mubr.msk.bf16.mxu1 %vm2257_vm1, %v2256_v1 }
 0x594   :  { %1925 = vmatprep.subr.bf16.mxu1 %v2256_v1 }
 0x595   :  { %1934 = vmatpush3.bf16.msra.mxu0 %v2366_v32 }
 0x596   :  { %1947 = vmatprep.subr.bf16.mxu0 %v2256_v1 }
 0x597   :  { %1926 = vmatpush3.bf16.msra.mxu1 %v2335_v5 }
 0x598   :  { %1939 = vmatprep.subr.bf16.mxu1 %v2256_v1 }
 0x59a   :  { %1928 = vmatmul.mubr.msk.bf16.vlgmr.msra.gmra.mrb[12].mxu1 %vm132_vm3, %v454_v23  ;;  %v710_v23 = vld [vmem:[#allocation2 + $0x6] sm:$0x3] }
 0x59b   :  { %1940 = vmatpush3.bf16.msra.mxu1 %v2360_v31  ;;  %1943 = vmatprep.mubr.msk.bf16.mxu1 %vm2257_vm1, %v2256_v1 }
 0x59c   :  { %1941 = vmatprep.subr.bf16.mxu1 %v2256_v1 }
 0x59f   :  { %1942 = vmatpush3.bf16.msra.mxu1 %v2372_v33 }
 0x5a0   :  { %1955 = vmatprep.subr.bf16.mxu1 %v2256_v1 }
 0x663   :  { %v492_v25 = vpop.f32.mrb[12].mxu0 }
 0x664   :  { %v1921_v26 = vpop.f32.mrb[13].mxu0 }
 0x665   :  { %v446_v27 = vpop.f32.mrb[8].mxu1  ;;  %v495_v28 = vpop.f32.mrb[14].mxu0 }
 0x666   :  { %v493_v29 = vadd.f32 %v492_v25, %v446_v27  ;;  %v1913_v34 = vpop.f32.mrb[9].mxu1  ;;  %v1922_v35 = vpop.f32.mrb[15].mxu0 }
 0x667   :  { %v449_v36 = vpop.f32.mrb[10].mxu1 }
 0x668   :  { %v498_v37 = vadd.f32 %v2405_v43, %v493_v29  ;;  %v1914_v38 = vpop.f32.mrb[11].mxu1 }
 0x66a   :  { %2122 = vtanh.f32 %v498_v37  ;;  %v1757_v48 = vmul.f32 -1.442695, %v498_v37 }
 0x66d   :  { %v559_v40 = vpop.f32.mrb[12].mxu1 }
 0x66e   :  { %v565_v41 = vadd.f32 %v559_v40, %v524_v39  ;;  %v1929_v42 = vpop.f32.mrb[13].mxu1 }
 0x66f   :  { %v562_v44 = vpop.f32.mrb[14].mxu1 }
 0x670   :  { %2124 = vtanh.f32 %v565_v41  ;;  %v1930_v45 = vpop.f32.mrb[15].mxu1  ;;  %v1759_v49 = vmul.f32 -1.442695, %v565_v41 }
 0x671   :  { %2126 = vpow2.f32 %v1757_v48 }
 0x672   :  { %2128 = vpow2.f32 %v1759_v49 }
 0x674   :  { %v2123_v46 = vpop.eup %2122 }
 0x675   :  { %508 = vrot.lane.b32.xlu0 %v2123_v46, %s2259_s17 }
 0x67a   :  { %v2125_v47 = vpop.eup %2124 }
 0x67b   :  { %575 = vrot.lane.b32.xlu1 %v2125_v47, %s2259_s17  ;;  %v2127_v50 = vpop.eup %2126 }
 0x67c   :  { %v502_v51 = vadd.f32 1.0, %v2127_v50  ;;  %v2129_v52 = vpop.eup %2128 }
 0x67d   :  { %v569_v53 = vadd.f32 1.0, %v2129_v52 }
 0x67e   :  { %2130 = vrcp.f32 %v502_v51 }
 0x67f   :  { %2132 = vrcp.f32 %v569_v53 }
 0x688   :  { %v2131_v54 = vpop.eup %2130 }
 0x689   :  { %v2133_v57 = vpop.eup %2132  ;;  %v506_v60 = vmul.f32 %v2131_v54, %v2416_v14 }
 0x68a   :  { %v573_v63 = vmul.f32 %v2133_v57, %v2413_v11 }
 0x6e7   :  { %v509_v55 = vpop.permute.xlu0 %508 }
 0x6e8   :  { %v511_v56 = vmul.f32 %v2131_v54, %v509_v55 }
 0x6ea   :  { %513 = vrot.lane.b32.xlu0 %v511_v56, %s2259_s17 }
 0x6ed   :  { %v576_v58 = vpop.permute.xlu1 %575 }
 0x6ee   :  { %v578_v59 = vmul.f32 %v2133_v57, %v576_v58 }
 0x6f0   :  { %580 = vrot.lane.b32.xlu1 %v578_v59, %s2259_s17 }
 0x75c   :  { %v514_v61 = vpop.permute.xlu0 %513 }
 0x75d   :  { %v2450_v62 = vadd.f32 %v514_v61, %v506_v60 }
 0x75f   :  { %2134 = vtanh.f32 %v2450_v62 }
 0x762   :  { %v581_v0 = vpop.permute.xlu1 %580 }
 0x763   :  { %v2454_v2 = vadd.f32 %v581_v0, %v573_v63 }
 0x765   :  { %2136 = vtanh.f32 %v2454_v2 }
 0x769   :  { %v2135_v3 = vpop.eup %2134 }
 0x76a   :  { %519 = vrot.lane.b32.xlu0 %v2135_v3, %s2259_s17 }
 0x76f   :  { %v2137_v6 = vpop.eup %2136 }
 0x770   :  { %586 = vrot.lane.b32.xlu1 %v2137_v6, %s2259_s17 }
 0x7dc   :  { %v520_v7 = vpop.permute.xlu0 %519 }
 0x7dd   :  { %v522_v8 = vmul.f32 %v2131_v54, %v520_v7 }
 0x7df   :  { %v591_v9 = vpack.c.bf16 %v522_v8, %v522_v8 }
 0x7e1   :  { %593 = vrot.lane.b32.xlu0 %v591_v9, %s2260_s25 }
 0x7e2   :  { %v587_v10 = vpop.permute.xlu1 %586 }
 0x7e3   :  { %v589_v12 = vmul.f32 %v2133_v57, %v587_v10 }
 0x7e5   :  { %v590_v13 = vpack.c.bf16 %v589_v12, %v589_v12 }
 0x7e7   :  { %639 = vrot.lane.b32.xlu1 %v590_v13, %s2260_s25 }
 0x853   :  { %v594_v11 = vpop.permute.xlu0 %593 }
 0x854   :  { %1936 = vmatmul.mubr.msk.bf16.vlgmr.msra.gmra.mrb[16].mxu0 %vm132_vm3, %v594_v11 }
 0x855   :  { %1948 = vmatpush3.bf16.msra.mxu0 %v2326_v4  ;;  %1951 = vmatprep.mubr.msk.bf16.mxu0 %vm2257_vm1, %v2256_v1 }
 0x856   :  { %1949 = vmatprep.subr.bf16.mxu0 %v2256_v1 }
 0x859   :  { %1950 = vmatpush3.bf16.msra.mxu0 %v2335_v5  ;;  %v640_v14 = vpop.permute.xlu1 %639 }
 0x85a   :  { %1944 = vmatmul.mubr.msk.bf16.vlgmr.msra.gmra.mrb[16].mxu1 %vm132_vm3, %v640_v14  ;;  %1963 = vmatprep.subr.bf16.mxu0 %v2256_v1 }
 0x85b   :  { %1956 = vmatpush3.bf16.msra.mxu1 %v2355_v30  ;;  %1959 = vmatprep.mubr.msk.bf16.mxu1 %vm2257_vm1, %v2256_v1 }
 0x85c   :  { %1952 = vmatmul.mubr.msk.bf16.vlgmr.msra.gmra.mrb[20].mxu0 %vm132_vm3, %v640_v14  ;;  %1957 = vmatprep.subr.bf16.mxu1 %v2256_v1 }
 0x85d   :  { %1964 = vmatpush3.bf16.msra.mxu0 %v2360_v31  ;;  %1967 = vmatprep.mubr.msk.bf16.mxu0 %vm2257_vm1, %v2256_v1 }
 0x85e   :  { %1965 = vmatprep.subr.bf16.mxu0 %v2256_v1 }
 0x85f   :  { %1958 = vmatpush3.bf16.msra.mxu1 %v2366_v32 }
 0x860   :  { %1971 = vmatprep.subr.bf16.mxu1 %v2256_v1 }
 0x861   :  { %1966 = vmatpush3.bf16.msra.mxu0 %v2372_v33 }
 0x862   :  { %1979 = vmatprep.subr.bf16.mxu0 %v2256_v1 }
 0x927   :  { %v632_v15 = vpop.f32.mrb[16].mxu0 }
 0x928   :  { %v1937_v16 = vpop.f32.mrb[17].mxu0 }
 0x929   :  { %v635_v17 = vpop.f32.mrb[18].mxu0 }
 0x92a   :  { %v1938_v18 = vpop.f32.mrb[19].mxu0 }
 0x92d   :  { %v678_v19 = vpop.f32.mrb[16].mxu1 }
 0x92e   :  { %v679_v20 = vadd.f32 %v678_v19, %v632_v15  ;;  %v1945_v21 = vpop.f32.mrb[17].mxu1  ;;  %v896_v15 = vld [vmem:[#allocation2 + $0x8] sm:$0x3] }
 0x92f   :  { %v681_v22 = vpop.f32.mrb[18].mxu1  ;;  %v745_v24 = vpop.f32.mrb[20].mxu0 }
 0x930   :  { %v684_v25 = vadd.f32 %v2405_v43, %v679_v20  ;;  %v751_v26 = vadd.f32 %v745_v24, %v710_v23  ;;  %v1946_v27 = vpop.f32.mrb[19].mxu1  ;;  %v1953_v28 = vpop.f32.mrb[21].mxu0 }
 0x931   :  { %v748_v29 = vpop.f32.mrb[22].mxu0 }
 0x932   :  { %2138 = vtanh.f32 %v684_v25  ;;  %v1954_v34 = vpop.f32.mrb[23].mxu0  ;;  %v1762_v37 = vmul.f32 -1.442695, %v684_v25  ;;  %v1764_v38 = vmul.f32 -1.442695, %v751_v26 }
 0x933   :  { %2140 = vtanh.f32 %v751_v26 }
 0x934   :  { %2142 = vpow2.f32 %v1762_v37 }
 0x935   :  { %2144 = vpow2.f32 %v1764_v38 }
 0x93c   :  { %v2139_v35 = vpop.eup %2138 }
 0x93d   :  { %v2141_v36 = vpop.eup %2140  ;;  %694 = vrot.lane.b32.xlu0 %v2139_v35, %s2259_s17 }
 0x93e   :  { %761 = vrot.lane.b32.xlu1 %v2141_v36, %s2259_s17  ;;  %v2143_v39 = vpop.eup %2142 }
 0x93f   :  { %v2145_v40 = vpop.eup %2144  ;;  %v688_v41 = vadd.f32 1.0, %v2143_v39 }
 0x940   :  { %v755_v42 = vadd.f32 1.0, %v2145_v40 }
 0x941   :  { %2146 = vrcp.f32 %v688_v41 }
 0x942   :  { %2148 = vrcp.f32 %v755_v42 }
 0x94b   :  { %v2147_v44 = vpop.eup %2146 }
 0x94c   :  { %v2149_v46 = vpop.eup %2148  ;;  %v692_v50 = vmul.f32 %v2147_v44, %v2450_v62 }
 0x94d   :  { %v759_v52 = vmul.f32 %v2149_v46, %v2454_v2 }
 0x9af   :  { %v695_v45 = vpop.permute.xlu0 %694 }
 0x9b0   :  { %v697_v47 = vmul.f32 %v2147_v44, %v695_v45  ;;  %v762_v48 = vpop.permute.xlu1 %761 }
 0x9b1   :  { %v764_v49 = vmul.f32 %v2149_v46, %v762_v48 }
 0x9b2   :  { %699 = vrot.lane.b32.xlu0 %v697_v47, %s2259_s17 }
 0x9b3   :  { %766 = vrot.lane.b32.xlu1 %v764_v49, %s2259_s17 }
 0xa24   :  { %v700_v51 = vpop.permute.xlu0 %699 }
 0xa25   :  { %v2489_v53 = vadd.f32 %v700_v51, %v692_v50  ;;  %v767_v54 = vpop.permute.xlu1 %766 }
 0xa26   :  { %v2491_v55 = vadd.f32 %v767_v54, %v759_v52 }
 0xa27   :  { %2150 = vtanh.f32 %v2489_v53 }
 0xa28   :  { %2152 = vtanh.f32 %v2491_v55 }
 0xa31   :  { %v2151_v56 = vpop.eup %2150 }
 0xa32   :  { %v2153_v57 = vpop.eup %2152  ;;  %705 = vrot.lane.b32.xlu0 %v2151_v56, %s2259_s17 }
 0xa33   :  { %772 = vrot.lane.b32.xlu1 %v2153_v57, %s2259_s17 }
 0xaa4   :  { %v706_v58 = vpop.permute.xlu0 %705 }
 0xaa5   :  { %v708_v59 = vmul.f32 %v2147_v44, %v706_v58  ;;  %v773_v60 = vpop.permute.xlu1 %772 }
 0xaa6   :  { %v775_v61 = vmul.f32 %v2149_v46, %v773_v60 }
 0xaa7   :  { %v777_v62 = vpack.c.bf16 %v708_v59, %v708_v59 }
 0xaa8   :  { %v776_v63 = vpack.c.bf16 %v775_v61, %v775_v61 }
 0xaa9   :  { %779 = vrot.lane.b32.xlu0 %v777_v62, %s2260_s25 }
 0xaaa   :  { %825 = vrot.lane.b32.xlu1 %v776_v63, %s2260_s25 }
 0xb1b   :  { %v780_v0 = vpop.permute.xlu0 %779 }
 0xb1c   :  { %v826_v2 = vpop.permute.xlu1 %825  ;;  %1960 = vmatmul.mubr.msk.bf16.vlgmr.msra.gmra.mrb[20].mxu1 %vm132_vm3, %v780_v0 }
 0xb1d   :  { %1968 = vmatmul.mubr.msk.bf16.vlgmr.msra.gmra.mrb[24].mxu0 %vm132_vm3, %v826_v2  ;;  %1972 = vmatpush3.bf16.msra.mxu1 %v2326_v4 }
 0xb1e   :  { %1973 = vmatprep.subr.bf16.mxu1 %v2256_v1  ;;  %1975 = vmatprep.mubr.msk.bf16.mxu1 %vm2257_vm1, %v2256_v1 }
 0xb1f   :  { %1980 = vmatpush3.bf16.msra.mxu0 %v2355_v30  ;;  %1983 = vmatprep.mubr.msk.bf16.mxu0 %vm2257_vm1, %v2256_v1 }
 0xb20   :  { %1981 = vmatprep.subr.bf16.mxu0 %v2256_v1 }
 0xb21   :  { %1974 = vmatpush3.bf16.msra.mxu1 %v2335_v5 }
 0xb22   :  { %1987 = vmatprep.subr.bf16.mxu1 %v2256_v1 }
 0xb23   :  { %1982 = vmatpush3.bf16.msra.mxu0 %v2366_v32 }
 0xb24   :  { %1976 = vmatmul.mubr.msk.bf16.vlgmr.msra.gmra.mrb[24].mxu1 %vm132_vm3, %v826_v2  ;;  %1995 = vmatprep.subr.bf16.mxu0 %v2256_v1  ;;  %v1082_v2 = vld [vmem:[#allocation2 + $0xa] sm:$0x3] }
 0xb25   :  { %1988 = vmatpush3.bf16.msra.mxu1 %v2360_v31  ;;  %1991 = vmatprep.mubr.msk.bf16.mxu1 %vm2257_vm1, %v2256_v1 }
 0xb26   :  { %1989 = vmatprep.subr.bf16.mxu1 %v2256_v1 }
 0xb29   :  { %1990 = vmatpush3.bf16.msra.mxu1 %v2372_v33 }
 0xb2a   :  { %2003 = vmatprep.subr.bf16.mxu1 %v2256_v1 }
 0xbef   :  { %v818_v3 = vpop.f32.mrb[20].mxu1 }
 0xbf0   :  { %v864_v6 = vpop.f32.mrb[24].mxu0  ;;  %v1961_v7 = vpop.f32.mrb[21].mxu1 }
 0xbf1   :  { %v865_v8 = vadd.f32 %v864_v6, %v818_v3  ;;  %v1969_v9 = vpop.f32.mrb[25].mxu0  ;;  %v821_v10 = vpop.f32.mrb[22].mxu1 }
 0xbf2   :  { %v867_v12 = vpop.f32.mrb[26].mxu0  ;;  %v1962_v13 = vpop.f32.mrb[23].mxu1 }
 0xbf3   :  { %v870_v11 = vadd.f32 %v2405_v43, %v865_v8  ;;  %v1970_v14 = vpop.f32.mrb[27].mxu0 }
 0xbf5   :  { %2154 = vtanh.f32 %v870_v11  ;;  %v1767_v23 = vmul.f32 -1.442695, %v870_v11 }
 0xbf7   :  { %v931_v16 = vpop.f32.mrb[24].mxu1 }
 0xbf8   :  { %v937_v17 = vadd.f32 %v931_v16, %v896_v15  ;;  %v1977_v18 = vpop.f32.mrb[25].mxu1 }
 0xbf9   :  { %v934_v19 = vpop.f32.mrb[26].mxu1 }
 0xbfa   :  { %2156 = vtanh.f32 %v937_v17  ;;  %v1978_v20 = vpop.f32.mrb[27].mxu1  ;;  %v1769_v24 = vmul.f32 -1.442695, %v937_v17 }
 0xbfb   :  { %2158 = vpow2.f32 %v1767_v23 }
 0xbfc   :  { %2160 = vpow2.f32 %v1769_v24 }
 0xbff   :  { %v2155_v21 = vpop.eup %2154 }
 0xc00   :  { %880 = vrot.lane.b32.xlu0 %v2155_v21, %s2259_s17 }
 0xc04   :  { %v2157_v22 = vpop.eup %2156 }
 0xc05   :  { %947 = vrot.lane.b32.xlu1 %v2157_v22, %s2259_s17  ;;  %v2159_v25 = vpop.eup %2158 }
 0xc06   :  { %v874_v26 = vadd.f32 1.0, %v2159_v25  ;;  %v2161_v27 = vpop.eup %2160 }
 0xc07   :  { %v941_v28 = vadd.f32 1.0, %v2161_v27 }
 0xc08   :  { %2162 = vrcp.f32 %v874_v26 }
 0xc09   :  { %2164 = vrcp.f32 %v941_v28 }
 0xc12   :  { %v2163_v29 = vpop.eup %2162 }
 0xc13   :  { %v2165_v36 = vpop.eup %2164  ;;  %v878_v39 = vmul.f32 %v2163_v29, %v2489_v53 }
 0xc14   :  { %v945_v42 = vmul.f32 %v2165_v36, %v2491_v55 }
 0xc72   :  { %v881_v34 = vpop.permute.xlu0 %880 }
 0xc73   :  { %v883_v35 = vmul.f32 %v2163_v29, %v881_v34 }
 0xc75   :  { %885 = vrot.lane.b32.xlu0 %v883_v35, %s2259_s17 }
 0xc77   :  { %v948_v37 = vpop.permute.xlu1 %947 }
 0xc78   :  { %v950_v38 = vmul.f32 %v2165_v36, %v948_v37 }
 0xc7a   :  { %952 = vrot.lane.b32.xlu1 %v950_v38, %s2259_s17 }
 0xce7   :  { %v886_v40 = vpop.permute.xlu0 %885 }
 0xce8   :  { %v2526_v41 = vadd.f32 %v886_v40, %v878_v39 }
 0xcea   :  { %2166 = vtanh.f32 %v2526_v41 }
 0xcec   :  { %v953_v44 = vpop.permute.xlu1 %952 }
 0xced   :  { %v2530_v45 = vadd.f32 %v953_v44, %v945_v42 }
 0xcef   :  { %2168 = vtanh.f32 %v2530_v45 }
 0xcf4   :  { %v2167_v46 = vpop.eup %2166 }
 0xcf5   :  { %891 = vrot.lane.b32.xlu0 %v2167_v46, %s2259_s17 }
 0xcf9   :  { %v2169_v47 = vpop.eup %2168 }
 0xcfa   :  { %958 = vrot.lane.b32.xlu1 %v2169_v47, %s2259_s17 }
 0xd67   :  { %v892_v48 = vpop.permute.xlu0 %891 }
 0xd68   :  { %v894_v49 = vmul.f32 %v2163_v29, %v892_v48 }
 0xd6a   :  { %v963_v50 = vpack.c.bf16 %v894_v49, %v894_v49 }
 0xd6c   :  { %965 = vrot.lane.b32.xlu0 %v963_v50, %s2260_s25  ;;  %v959_v51 = vpop.permute.xlu1 %958 }
 0xd6d   :  { %v961_v52 = vmul.f32 %v2165_v36, %v959_v51 }
 0xd6f   :  { %v962_v53 = vpack.c.bf16 %v961_v52, %v961_v52  ;;  %v1268_v52 = vld [vmem:[#allocation2 + $0xc] sm:$0x3] }
 0xd71   :  { %1011 = vrot.lane.b32.xlu1 %v962_v53, %s2260_s25 }
 0xdde   :  { %v966_v54 = vpop.permute.xlu0 %965 }
 0xddf   :  { %1984 = vmatmul.mubr.msk.bf16.vlgmr.msra.gmra.mrb[28].mxu0 %vm132_vm3, %v966_v54 }
 0xde0   :  { %1996 = vmatpush3.bf16.msra.mxu0 %v2326_v4  ;;  %1999 = vmatprep.mubr.msk.bf16.mxu0 %vm2257_vm1, %v2256_v1 }
 0xde1   :  { %1997 = vmatprep.subr.bf16.mxu0 %v2256_v1 }
 0xde3   :  { %v1012_v55 = vpop.permute.xlu1 %1011 }
 0xde4   :  { %1998 = vmatpush3.bf16.msra.mxu0 %v2335_v5  ;;  %1992 = vmatmul.mubr.msk.bf16.vlgmr.msra.gmra.mrb[28].mxu1 %vm132_vm3, %v1012_v55 }
 0xde5   :  { %2011 = vmatprep.subr.bf16.mxu0 %v2256_v1  ;;  %2004 = vmatpush3.bf16.msra.mxu1 %v2355_v30 }
 0xde6   :  { %2005 = vmatprep.subr.bf16.mxu1 %v2256_v1  ;;  %2007 = vmatprep.mubr.msk.bf16.mxu1 %vm2257_vm1, %v2256_v1 }
 0xde7   :  { %2000 = vmatmul.mubr.msk.bf16.vlgmr.msra.gmra.mrb[32].mxu0 %vm132_vm3, %v1012_v55 }
 0xde8   :  { %2012 = vmatpush3.bf16.msra.mxu0 %v2360_v31  ;;  %2015 = vmatprep.mubr.msk.bf16.mxu0 %vm2257_vm1, %v2256_v1 }
 0xde9   :  { %2013 = vmatprep.subr.bf16.mxu0 %v2256_v1  ;;  %2006 = vmatpush3.bf16.msra.mxu1 %v2366_v32 }
 0xdea   :  { %2019 = vmatprep.subr.bf16.mxu1 %v2256_v1 }
 0xdec   :  { %2014 = vmatpush3.bf16.msra.mxu0 %v2372_v33 }
 0xded   :  { %2027 = vmatprep.subr.bf16.mxu0 %v2256_v1 }
 0xeb2   :  { %v1004_v56 = vpop.f32.mrb[28].mxu0 }
 0xeb3   :  { %v1985_v57 = vpop.f32.mrb[29].mxu0 }
 0xeb4   :  { %v1007_v58 = vpop.f32.mrb[30].mxu0 }
 0xeb5   :  { %v1986_v59 = vpop.f32.mrb[31].mxu0 }
 0xeb7   :  { %v1050_v60 = vpop.f32.mrb[28].mxu1 }
 0xeb8   :  { %v1051_v61 = vadd.f32 %v1050_v60, %v1004_v56  ;;  %v1993_v62 = vpop.f32.mrb[29].mxu1 }
 0xeb9   :  { %v1053_v63 = vpop.f32.mrb[30].mxu1 }
 0xeba   :  { %v1056_v0 = vadd.f32 %v2405_v43, %v1051_v61  ;;  %v1117_v3 = vpop.f32.mrb[32].mxu0  ;;  %v1994_v6 = vpop.f32.mrb[31].mxu1 }
 0xebb   :  { %v1123_v7 = vadd.f32 %v1117_v3, %v1082_v2  ;;  %v2001_v8 = vpop.f32.mrb[33].mxu0 }
 0xebc   :  { %2170 = vtanh.f32 %v1056_v0  ;;  %v1120_v9 = vpop.f32.mrb[34].mxu0  ;;  %v1772_v11 = vmul.f32 -1.442695, %v1056_v0 }
 0xebd   :  { %2172 = vtanh.f32 %v1123_v7  ;;  %v2002_v10 = vpop.f32.mrb[35].mxu0  ;;  %v1774_v14 = vmul.f32 -1.442695, %v1123_v7 }
 0xebe   :  { %2174 = vpow2.f32 %v1772_v11 }
 0xebf   :  { %2176 = vpow2.f32 %v1774_v14 }
 0xec6   :  { %v2171_v12 = vpop.eup %2170 }
 0xec7   :  { %v2173_v13 = vpop.eup %2172  ;;  %1066 = vrot.lane.b32.xlu0 %v2171_v12, %s2259_s17 }
 0xec8   :  { %1133 = vrot.lane.b32.xlu1 %v2173_v13, %s2259_s17  ;;  %v2175_v15 = vpop.eup %2174 }
 0xec9   :  { %v2177_v16 = vpop.eup %2176  ;;  %v1060_v17 = vadd.f32 1.0, %v2175_v15 }
 0xeca   :  { %v1127_v18 = vadd.f32 1.0, %v2177_v16 }
 0xecb   :  { %2178 = vrcp.f32 %v1060_v17 }
 0xecc   :  { %2180 = vrcp.f32 %v1127_v18 }
 0xed5   :  { %v2179_v19 = vpop.eup %2178 }
 0xed6   :  { %v2181_v21 = vpop.eup %2180  ;;  %v1064_v25 = vmul.f32 %v2179_v19, %v2526_v41 }
 0xed7   :  { %v1131_v27 = vmul.f32 %v2181_v21, %v2530_v45 }
 0xf39   :  { %v1067_v20 = vpop.permute.xlu0 %1066 }
 0xf3a   :  { %v1069_v22 = vmul.f32 %v2179_v19, %v1067_v20  ;;  %v1134_v23 = vpop.permute.xlu1 %1133 }
 0xf3b   :  { %v1136_v24 = vmul.f32 %v2181_v21, %v1134_v23 }
 0xf3c   :  { %1071 = vrot.lane.b32.xlu0 %v1069_v22, %s2259_s17 }
 0xf3d   :  { %1138 = vrot.lane.b32.xlu1 %v1136_v24, %s2259_s17 }
 0xfae   :  { %v1072_v26 = vpop.permute.xlu0 %1071 }
 0xfaf   :  { %v2565_v28 = vadd.f32 %v1072_v26, %v1064_v25  ;;  %v1139_v29 = vpop.permute.xlu1 %1138  ;;  %v2226_v25 = vld [vmem:[%s2694_s2] sm:$0xff]  }
 0xfb0   :  { %v2567_v34 = vadd.f32 %v1139_v29, %v1131_v27  ;;  %v2227_v27 = vld [vmem:[%s2694_s2 + $0x8] sm:$0xff]  }
 0xfb1   :  { %2182 = vtanh.f32 %v2565_v28  ;;  %v2230_v29 = vld [vmem:[%s2696_s4 + $0x8] sm:$0xff]  }
 0xfb2   :  { %2184 = vtanh.f32 %v2567_v34 }
 0xfbb   :  { %v2183_v35 = vpop.eup %2182 }
 0xfbc   :  { %v2185_v36 = vpop.eup %2184  ;;  %1077 = vrot.lane.b32.xlu0 %v2183_v35, %s2259_s17 }
 0xfbd   :  { %1144 = vrot.lane.b32.xlu1 %v2185_v36, %s2259_s17 }
0x102e   :  { %v1078_v37 = vpop.permute.xlu0 %1077 }
0x102f   :  { %v1080_v38 = vmul.f32 %v2179_v19, %v1078_v37  ;;  %v1145_v39 = vpop.permute.xlu1 %1144 }
0x1030   :  { %v1147_v40 = vmul.f32 %v2181_v21, %v1145_v39 }
0x1031   :  { %v1149_v41 = vpack.c.bf16 %v1080_v38, %v1080_v38 }
0x1032   :  { %v1148_v42 = vpack.c.bf16 %v1147_v40, %v1147_v40 }
0x1033   :  { %1151 = vrot.lane.b32.xlu0 %v1149_v41, %s2260_s25 }
0x1034   :  { %1197 = vrot.lane.b32.xlu1 %v1148_v42, %s2260_s25 }
0x10a5   :  { %v1152_v44 = vpop.permute.xlu0 %1151 }
0x10a6   :  { %v1198_v45 = vpop.permute.xlu1 %1197  ;;  %2008 = vmatmul.mubr.msk.bf16.vlgmr.msra.gmra.mrb[32].mxu1 %vm132_vm3, %v1152_v44  ;;  %v1454_v44 = vld [vmem:[#allocation2 + $0xe] sm:$0x3] }
0x10a7   :  { %2016 = vmatmul.mubr.msk.bf16.vlgmr.msra.gmra.mrb[36].mxu0 %vm132_vm3, %v1198_v45  ;;  %2020 = vmatpush3.bf16.msra.mxu1 %v2326_v4 }
0x10a8   :  { %2021 = vmatprep.subr.bf16.mxu1 %v2256_v1  ;;  %2023 = vmatprep.mubr.msk.bf16.mxu1 %vm2257_vm1, %v2256_v1 }
0x10a9   :  { %2028 = vmatpush3.bf16.msra.mxu0 %v2355_v30  ;;  %2031 = vmatprep.mubr.msk.bf16.mxu0 %vm2257_vm1, %v2256_v1 }
0x10aa   :  { %2029 = vmatprep.subr.bf16.mxu0 %v2256_v1 }
0x10ab   :  { %2022 = vmatpush3.bf16.msra.mxu1 %v2335_v5 }
0x10ac   :  { %2035 = vmatprep.subr.bf16.mxu1 %v2256_v1 }
0x10ad   :  { %2030 = vmatpush3.bf16.msra.mxu0 %v2366_v32 }
0x10ae   :  { %2024 = vmatmul.mubr.msk.bf16.vlgmr.msra.gmra.mrb[36].mxu1 %vm132_vm3, %v1198_v45  ;;  %2043 = vmatprep.subr.bf16.mxu0 %v2256_v1 }
0x10af   :  { %2036 = vmatpush3.bf16.msra.mxu1 %v2360_v31  ;;  %2039 = vmatprep.mubr.msk.bf16.mxu1 %vm2257_vm1, %v2256_v1 }
0x10b0   :  { %2037 = vmatprep.subr.bf16.mxu1 %v2256_v1 }
0x10b3   :  { %2038 = vmatpush3.bf16.msra.mxu1 %v2372_v33 }
0x10b4   :  { %2051 = vmatprep.subr.bf16.mxu1 %v2256_v1 }
0x1179   :  { %v1190_v4 = vpop.f32.mrb[32].mxu1 }
0x117a   :  { %v1236_v5 = vpop.f32.mrb[36].mxu0  ;;  %v2009_v46 = vpop.f32.mrb[33].mxu1 }
0x117b   :  { %v1237_v47 = vadd.f32 %v1236_v5, %v1190_v4  ;;  %v2017_v32 = vpop.f32.mrb[37].mxu0  ;;  %v1193_v48 = vpop.f32.mrb[34].mxu1 }
0x117c   :  { %v1239_v49 = vpop.f32.mrb[38].mxu0  ;;  %v2010_v50 = vpop.f32.mrb[35].mxu1 }
0x117d   :  { %v1242_v51 = vadd.f32 %v2405_v43, %v1237_v47  ;;  %v2018_v31 = vpop.f32.mrb[39].mxu0 }
0x117f   :  { %2186 = vtanh.f32 %v1242_v51  ;;  %v1777_v59 = vmul.f32 -1.442695, %v1242_v51 }
0x1181   :  { %v1303_v53 = vpop.f32.mrb[36].mxu1 }
0x1182   :  { %v1309_v54 = vadd.f32 %v1303_v53, %v1268_v52  ;;  %v2025_v55 = vpop.f32.mrb[37].mxu1 }
0x1183   :  { %v1306_v56 = vpop.f32.mrb[38].mxu1 }
0x1184   :  { %2188 = vtanh.f32 %v1309_v54  ;;  %v2026_v33 = vpop.f32.mrb[39].mxu1  ;;  %v1779_v60 = vmul.f32 -1.442695, %v1309_v54 }
0x1185   :  { %2190 = vpow2.f32 %v1777_v59 }
0x1186   :  { %2192 = vpow2.f32 %v1779_v60 }
0x1189   :  { %v2187_v57 = vpop.eup %2186 }
0x118a   :  { %1252 = vrot.lane.b32.xlu0 %v2187_v57, %s2259_s17 }
0x118e   :  { %v2189_v58 = vpop.eup %2188 }
0x118f   :  { %1319 = vrot.lane.b32.xlu1 %v2189_v58, %s2259_s17  ;;  %v2191_v61 = vpop.eup %2190 }
0x1190   :  { %v1246_v62 = vadd.f32 1.0, %v2191_v61  ;;  %v2193_v63 = vpop.eup %2192 }
0x1191   :  { %v1313_v0 = vadd.f32 1.0, %v2193_v63 }
0x1192   :  { %2194 = vrcp.f32 %v1246_v62 }
0x1193   :  { %2196 = vrcp.f32 %v1313_v0 }
0x119c   :  { %v2195_v2 = vpop.eup %2194 }
0x119d   :  { %v2197_v7 = vpop.eup %2196  ;;  %v1250_v10 = vmul.f32 %v2195_v2, %v2565_v28  ;;  %v2228_v28 = vld [vmem:[%s2696_s4] sm:$0xff]  }
0x119e   :  { %v1317_v11 = vmul.f32 %v2197_v7, %v2567_v34 }
0x11fc   :  { %v1253_v3 = vpop.permute.xlu0 %1252 }
0x11fd   :  { %v1255_v6 = vmul.f32 %v2195_v2, %v1253_v3 }
0x11ff   :  { %1257 = vrot.lane.b32.xlu0 %v1255_v6, %s2259_s17 }
0x1201   :  { %v1320_v8 = vpop.permute.xlu1 %1319 }
0x1202   :  { %v1322_v9 = vmul.f32 %v2197_v7, %v1320_v8 }
0x1204   :  { %1324 = vrot.lane.b32.xlu1 %v1322_v9, %s2259_s17 }
0x1271   :  { %v1258_v12 = vpop.permute.xlu0 %1257 }
0x1272   :  { %v2602_v13 = vadd.f32 %v1258_v12, %v1250_v10 }
0x1274   :  { %2198 = vtanh.f32 %v2602_v13 }
0x1276   :  { %v1325_v14 = vpop.permute.xlu1 %1324 }
0x1277   :  { %v2606_v15 = vadd.f32 %v1325_v14, %v1317_v11 }
0x1279   :  { %2200 = vtanh.f32 %v2606_v15 }
0x127e   :  { %v2199_v16 = vpop.eup %2198 }
0x127f   :  { %1263 = vrot.lane.b32.xlu0 %v2199_v16, %s2259_s17 }
0x1283   :  { %v2201_v17 = vpop.eup %2200 }
0x1284   :  { %1330 = vrot.lane.b32.xlu1 %v2201_v17, %s2259_s17 }
0x12f1   :  { %v1264_v18 = vpop.permute.xlu0 %1263 }
0x12f2   :  { %v1266_v19 = vmul.f32 %v2195_v2, %v1264_v18 }
0x12f4   :  { %v1335_v20 = vpack.c.bf16 %v1266_v19, %v1266_v19 }
0x12f6   :  { %1337 = vrot.lane.b32.xlu0 %v1335_v20, %s2260_s25  ;;  %v1331_v21 = vpop.permute.xlu1 %1330 }
0x12f7   :  { %v1333_v22 = vmul.f32 %v2197_v7, %v1331_v21 }
0x12f9   :  { %v1334_v23 = vpack.c.bf16 %v1333_v22, %v1333_v22  ;;  %v2231_v22 = vld [vmem:[%s2698_s6] ss:$0 sm:$0xff] }
0x12fb   :  { %1383 = vrot.lane.b32.xlu1 %v1334_v23, %s2260_s25 }
0x1368   :  { %v1338_v24 = vpop.permute.xlu0 %1337 }
0x1369   :  { %2032 = vmatmul.mubr.msk.bf16.vlgmr.msra.gmra.mrb[40].mxu0 %vm132_vm3, %v1338_v24 }
0x136a   :  { %2044 = vmatpush3.bf16.msra.mxu0 %v2226_v25  ;;  %2047 = vmatprep.mubr.msk.bf16.mxu0 %vm2257_vm1, %v2256_v1 }
0x136b   :  { %2045 = vmatprep.subr.bf16.mxu0 %v2256_v1 }
0x136d   :  { %v1384_v26 = vpop.permute.xlu1 %1383 }
0x136e   :  { %2046 = vmatpush3.bf16.msra.mxu0 %v2227_v27  ;;  %2040 = vmatmul.mubr.msk.bf16.vlgmr.msra.gmra.mrb[40].mxu1 %vm132_vm3, %v1384_v26 }
0x136f   :  { %2059 = vmatprep.subr.bf16.mxu0 %v2256_v1  ;;  %2052 = vmatpush3.bf16.msra.mxu1 %v2355_v30  ;;  %v2229_v30 = vld [vmem:[%s2697_s5 + $0x8] sm:$0xff]  }
0x1370   :  { %2053 = vmatprep.subr.bf16.mxu1 %v2256_v1  ;;  %2055 = vmatprep.mubr.msk.bf16.mxu1 %vm2257_vm1, %v2256_v1 }
0x1371   :  { %2048 = vmatmul.mubr.msk.bf16.vlgmr.msra.gmra.mrb[44].mxu0 %vm132_vm3, %v1384_v26 }
0x1372   :  { %2060 = vmatpush3.bf16.msra.mxu0 %v2228_v28  ;;  %2063 = vmatprep.mubr.msk.bf16.mxu0 %vm2257_vm1, %v2256_v1 }
0x1373   :  { %2061 = vmatprep.subr.bf16.mxu0 %v2256_v1  ;;  %2054 = vmatpush3.bf16.msra.mxu1 %v2229_v30 }
0x1376   :  { %2062 = vmatpush3.bf16.msra.mxu0 %v2230_v29 }
0x143c   :  { %v1376_v34 = vpop.f32.mrb[40].mxu0 }
0x143d   :  { %v2033_v35 = vpop.f32.mrb[41].mxu0 }
0x143e   :  { %v1379_v36 = vpop.f32.mrb[42].mxu0 }
0x143f   :  { %v2034_v37 = vpop.f32.mrb[43].mxu0 }
0x1440   :  { %v1639_v37 = vld [vmem:[%s2699_s7] sm:$0xff] }
0x1441   :  { %v1422_v38 = vpop.f32.mrb[40].mxu1 }
0x1442   :  { %v1423_v39 = vadd.f32 %v1422_v38, %v1376_v34  ;;  %v2041_v40 = vpop.f32.mrb[41].mxu1  ;;  %v1640_v38 = vld [vmem:[%s2699_s7 + $0x8] sm:$0xff] }
0x1443   :  { %v1425_v41 = vpop.f32.mrb[42].mxu1  ;;  %v2261_v40 = vmov 0.0|0.0  }
0x1444   :  { %v1428_v42 = vadd.f32 %v2405_v43, %v1423_v39  ;;  %v1489_v45 = vpop.f32.mrb[44].mxu0  ;;  %v2042_v4 = vpop.f32.mrb[43].mxu1  ;;  %v1641_v39 = vld [vmem:[%s2699_s7 + $0x10] sm:$0xff]  ;;  %2078 = vmatprep.subr.bf16.mxu1 %v2261_v40  ;;  %v2079_v41 = vpack.c.bf16 %v1640_v38, %v1639_v37 }
0x1445   :  { %v1495_v5 = vadd.f32 %v1489_v45, %v1454_v44  ;;  %v2049_v46 = vpop.f32.mrb[45].mxu0 }
0x1446   :  { %2202 = vtanh.f32 %v1428_v42  ;;  %v1492_v47 = vpop.f32.mrb[46].mxu0  ;;  %v1782_v50 = vmul.f32 -1.442695, %v1428_v42  ;;  %v1642_v42 = vld [vmem:[%s2699_s7 + $0x18] sm:$0xff]  ;;  %s1732_s7 = sshll.u32 %s2262_s23, 4  ;;  %s1733_s7 = int_to_ptr.vmem [resolvable:$true] %s1732_s7 }
0x1447   :  { %2204 = vtanh.f32 %v1495_v5  ;;  %v2050_v32 = vpop.f32.mrb[47].mxu0  ;;  %v1784_v51 = vmul.f32 -1.442695, %v1495_v5  ;;  %v2082_v44 = vpack.c.bf16 %v1642_v42, %v1641_v39  ;;  %v1788_v47 = vld [vmem:[%s2700_s8] ss:$0 sm:$0xff]  ;;  %s2232_s24 = scalar_lea.vmem %s1733_s7, 32  ;;  %p2237_p1 = scmp.lt.s32.totalorder %s1733_s7, %s1733_s7 }
0x1448   :  { %2206 = vpow2.f32 %v1782_v50  ;;  %p2233_p0 = scmp.ne.s32.totalorder %s1733_s7, %s2232_s24  ;;  %p2238_p2 = scmp.lt.s32.totalorder %s2232_s24, %s2232_s24 }
0x1449   :  { %2208 = vpow2.f32 %v1784_v51 }
0x144a   :  { %p2239_p3 = por %p2238_p2, %p2237_p1 }
0x144c   :  { %p2240_p4 = pnand %p2239_p3, %p2233_p0 }
0x1450   :  { %v2203_v48 = vpop.eup %2202 }
0x1451   :  { %v2205_v49 = vpop.eup %2204  ;;  %1438 = vrot.lane.b32.xlu0 %v2203_v48, %s2259_s17 }
0x1452   :  { %1505 = vrot.lane.b32.xlu1 %v2205_v49, %s2259_s17  ;;  %v2207_v43 = vpop.eup %2206 }
0x1453   :  { %v2209_v31 = vpop.eup %2208  ;;  %v1432_v52 = vadd.f32 1.0, %v2207_v43 }
0x1454   :  { %v1499_v53 = vadd.f32 1.0, %v2209_v31 }
0x1455   :  { %2210 = vrcp.f32 %v1432_v52 }
0x1456   :  { %2212 = vrcp.f32 %v1499_v53 }
0x145f   :  { %v2211_v54 = vpop.eup %2210 }
0x1460   :  { %v2213_v56 = vpop.eup %2212  ;;  %v1436_v59 = vmul.f32 %v2211_v54, %v2602_v13 }
0x1461   :  { %v1503_v61 = vmul.f32 %v2213_v56, %v2606_v15 }
0x14c3   :  { %v1439_v55 = vpop.permute.xlu0 %1438 }
0x14c4   :  { %v1441_v33 = vmul.f32 %v2211_v54, %v1439_v55  ;;  %v1506_v57 = vpop.permute.xlu1 %1505 }
0x14c5   :  { %v1508_v58 = vmul.f32 %v2213_v56, %v1506_v57 }
0x14c6   :  { %1443 = vrot.lane.b32.xlu0 %v1441_v33, %s2259_s17 }
0x14c7   :  { %1510 = vrot.lane.b32.xlu1 %v1508_v58, %s2259_s17 }
0x1538   :  { %v1444_v60 = vpop.permute.xlu0 %1443 }
0x1539   :  { %v1446_v62 = vadd.f32 %v1444_v60, %v1436_v59  ;;  %v1511_v63 = vpop.permute.xlu1 %1510 }
0x153a   :  { %v1513_v0 = vadd.f32 %v1511_v63, %v1503_v61 }
0x153b   :  { %2214 = vtanh.f32 %v1446_v62 }
0x153c   :  { %2216 = vtanh.f32 %v1513_v0 }
0x1545   :  { %v2215_v2 = vpop.eup %2214 }
0x1546   :  { %v2217_v3 = vpop.eup %2216  ;;  %1449 = vrot.lane.b32.xlu0 %v2215_v2, %s2259_s17 }
0x1547   :  { %1516 = vrot.lane.b32.xlu1 %v2217_v3, %s2259_s17 }
0x15b8   :  { %v1450_v6 = vpop.permute.xlu0 %1449 }
0x15b9   :  { %v1452_v7 = vmul.f32 %v2211_v54, %v1450_v6  ;;  %v1517_v8 = vpop.permute.xlu1 %1516 }
0x15ba   :  { %v1519_v9 = vmul.f32 %v2213_v56, %v1517_v8 }
0x15bb   :  { %v1521_v10 = vpack.c.bf16 %v1452_v7, %v1452_v7 }
0x15bc   :  { %v1520_v12 = vpack.c.bf16 %v1519_v9, %v1519_v9 }
0x15bd   :  { %1523 = vrot.lane.b32.xlu0 %v1521_v10, %s2260_s25 }
0x15be   :  { %1569 = vrot.lane.b32.xlu1 %v1520_v12, %s2260_s25 }
0x162f   :  { %v1524_v13 = vpop.permute.xlu0 %1523 }
0x1630   :  { %v1570_v11 = vpop.permute.xlu1 %1569  ;;  %2056 = vmatmul.mubr.msk.bf16.vlgmr.msra.gmra.mrb[44].mxu1 %vm132_vm3, %v1524_v13 }
0x1631   :  { %2064 = vmatmul.mubr.msk.bf16.vlgmr.msra.gmra.mrb[48].mxu0 %vm132_vm3, %v1570_v11  ;;  %2075 = vmatprep.mubr.msk.f32.mxu1 %vm2257_vm1, %v2256_v1 }
0x1632   :  { %2080 = vmatpush3.bf16.msra.mxu1 %v2079_v41 }
0x1633   :  { %2081 = vmatprep.subr.bf16.mxu1 %v2261_v40 }
0x1636   :  { %2083 = vmatpush3.bf16.msra.mxu1 %v2082_v44 }
0x1703   :  { %v1562_v14 = vpop.f32.mrb[44].mxu1 }
0x1704   :  { %v1608_v15 = vpop.f32.mrb[48].mxu0  ;;  %v2057_v16 = vpop.f32.mrb[45].mxu1 }
0x1705   :  { %v1609_v17 = vadd.f32 %v1608_v15, %v1562_v14  ;;  %v2065_v18 = vpop.f32.mrb[49].mxu0  ;;  %v1565_v19 = vpop.f32.mrb[46].mxu1 }
0x1706   :  { %v1611_v20 = vpop.f32.mrb[50].mxu0  ;;  %v2058_v21 = vpop.f32.mrb[47].mxu1 }
0x1707   :  { %v1614_v23 = vadd.f32 %v2231_v22, %v1609_v17  ;;  %v2066_v24 = vpop.f32.mrb[51].mxu0 }
0x1709   :  { %2218 = vtanh.f32 %v1614_v23  ;;  %v1787_v26 = vmul.f32 -1.442695, %v1614_v23 }
0x170b   :  { %2220 = vpow2.f32 %v1787_v26 }
0x1713   :  { %v2219_v25 = vpop.eup %2218 }
0x1714   :  { %1624 = vrot.lane.b32.xlu0 %v2219_v25, %s2259_s17 }
0x1715   :  { %v2221_v1 = vpop.eup %2220 }
0x1716   :  { %v1618_v27 = vadd.f32 1.0, %v2221_v1 }
0x1718   :  { %2222 = vrcp.f32 %v1618_v27 }
0x1722   :  { %v2223_v28 = vpop.eup %2222 }
0x1723   :  { %v1622_v34 = vmul.f32 %v2223_v28, %v1446_v62 }
0x1786   :  { %v1625_v30 = vpop.permute.xlu0 %1624 }
0x1787   :  { %v1627_v29 = vmul.f32 %v2223_v28, %v1625_v30 }
0x1789   :  { %1629 = vrot.lane.b32.xlu1 %v1627_v29, %s2259_s17 }
0x17fb   :  { %v1630_v35 = vpop.permute.xlu1 %1629 }
0x17fc   :  { %v1632_v36 = vadd.f32 %v1630_v35, %v1622_v34 }
0x17fe   :  { %2224 = vtanh.f32 %v1632_v36 }
0x1808   :  { %v2225_v45 = vpop.eup %2224 }
0x1809   :  { %1635 = vrot.lane.b32.xlu0 %v2225_v45, %s2259_s17 }
0x187b   :  { %v1636_v4 = vpop.permute.xlu0 %1635 }
0x187c   :  { %v1638_v5 = vmul.f32 %v2223_v28, %v1636_v4 }
0x187e   :  { %1651 = vrot.lane.b32.xlu1 %v1638_v5, %s2260_s25 }
0x18f0   :  { %v1652_v46 = vpop.permute.xlu1 %1651 }
0x18f1   :  { %2076 = vmatmul.mubr.msk.f32.vlgmr.msra.gmra.mrb[48].mxu1 %vm132_vm3, %v1652_v46 }
0x19c4   :  { %v1721_v32 = vpop.f32.mrb[48].mxu1 }
0x19c5   :  { %v1722_v48 = vadd.f32 %v1788_v47, %v1721_v32  ;;  %v2077_v49 = vpop.f32.mrb[49].mxu1 }
0x19c7   :  { %1725 = vst [vmem:[#allocation3] sm:$0x3] %v1722_v48 }
0x19c8   :  { %2243 = shalt.err (!%p2240_p4)
}
0x19c9   :  { %s2244_s26 = scalar_lea.hbm %s2701_s9, 32 }
0x19ca   :  { %p2245_p5 = scmp.ne.s32.totalorder %s2701_s9, %s2244_s26  ;;  %p2248_p6 = scmp.lt.u32.totalorder %s2244_s26, %s2701_s9 }
0x19cc   :  { %p2250_p7 = pnand %p2248_p6, %p2245_p5 }
0x19ce   :  { %2253 = shalt.err (!%p2250_p7)
}
0x19cf   :  { %1735 = dma.vmem_to_hbm [thread:$0]  %s1733_s7, 32, %s2701_s9, [#allocation4]  }
0x19d0   :  { %2254 = dma.done.wait [#allocation4], 32  }
0x19d1   :  { %2255 = vsyncadd [#allocation4], 4294967264 }
0x19d2   :  { %1739 = vsyncpa [#allocation4], 1 }

</bundles_post_ra>
